<compile_context>
chip_gen: v5e
topology: v5e:2x2
jax: 0.10.0
libtpu: 0.0.40
codegen_flags: <defaults>
</compile_context>

<pallas_src>
import jax
import jax.numpy as jnp
from jax.experimental import pallas as pl
from jax.experimental.pallas import tpu as pltpu


# ------------------------------ Pallas kernels ------------------------------

def gcn_layer1_kernel(a_ref, xw_ref, d_ref, b1_ref, h1_ref):
    """Row tile of: h1s = d * relu(d * ((A+I) @ xw1d) + b1)   (bf16 out).

    xw1d = d * (X @ W1) is precomputed (N x H, tiny); the output is pre-scaled
    by d so layer 2 can consume it directly.
    """
    t = jnp.dot(a_ref[...], xw_ref[...], preferred_element_type=jnp.float32)
    d = d_ref[...]                                   # (TILE, 1) f32
    h = jnp.maximum(t * d + b1_ref[...], 0.0)
    h1_ref[...] = (h * d).astype(jnp.bfloat16)


def gcn_layer2_softmax_kernel(a_ref, h1_ref, d_ref, w2_ref, b2_ref,
                              w3_ref, b3_ref, o_ref):
    """Row tile of: softmax( relu(d * (((A+I) @ h1s) @ W2) + b2) @ W3 + b3 )."""
    t = jnp.dot(a_ref[...], h1_ref[...], preferred_element_type=jnp.float32)
    t = jnp.dot(t.astype(jnp.bfloat16), w2_ref[...],
                preferred_element_type=jnp.float32)
    h2 = jnp.maximum(t * d_ref[...] + b2_ref[...], 0.0)
    # logits/softmax stay in f32 (padded-class bias -1e30 -> exp == 0 exactly;
    # v5e has no bf16 VPU/EUP).
    logits = jnp.dot(h2.astype(jnp.bfloat16), w3_ref[...],
                     preferred_element_type=jnp.float32) + b3_ref[...]
    m = jnp.max(logits, axis=-1, keepdims=True)
    e = jnp.exp(logits - m)
    denom = jnp.sum(e, axis=-1, keepdims=True)
    o_ref[...] = (e * pl.reciprocal(denom, approx=True)).astype(o_ref.dtype)


# ------------------------------ helpers ------------------------------

def _round_up(n, m):
    return ((n + m - 1) // m) * m


def _pad_to(arr, shape, fill=0.0):
    pads = [(0, s - d) for d, s in zip(arr.shape, shape)]
    return jnp.pad(arr, pads, constant_values=fill)


def _pick_tile(n_pad):
    # Largest row tile (per review: 512-1024 rows ~ 85% of HBM roofline;
    # 512 keeps the double-buffered A tile within v7x's 64 MiB VMEM).
    for t in (512, 256, 128):
        if n_pad % t == 0:
            return t
    return n_pad


def _vmem_limit_bytes(tile, n_pad, h_pad, c_pad):
    # double-buffered tiles + grid-resident operands + f32 intermediates + slack
    a_tile = tile * n_pad * 2
    resident = (n_pad * h_pad * 2 + h_pad * h_pad * 2 + h_pad * c_pad * 2
                + 2 * h_pad * 4 + c_pad * 4)
    d_tile = tile * 128 * 4
    out_tile = tile * max(h_pad, c_pad) * 2
    interm = 4 * tile * max(h_pad, c_pad) * 4
    need = 2 * (a_tile + resident + d_tile + out_tile) + interm + (2 << 20)
    # TODO(synk): v7x has only 64 MiB VMEM/TC -> for very large N shrink the row
    # tile rather than raising this cap.
    return int(min(max(need, 16 << 20), 100 << 20))


# ---------------- wrapper glue: padded operands (no dense f32 N^2 passes) ----------------

def _prepare_padded_inputs(params, x, edge_index):
    n, _ = x.shape
    h_dim = params["w1"].shape[1]
    c = params["w3"].shape[1]

    n_pad = _round_up(n, 128)
    h_pad = _round_up(h_dim, 128)
    c_pad = _round_up(c, 128)        # lane-dense output store

    src, dst = edge_index[0], edge_index[1]

    # Unnormalised adjacency with self loops, built once, at padded size, in bf16.
    a = jnp.zeros((n_pad, n_pad), jnp.bfloat16)
    a = a.at[dst, src].add(jnp.ones(src.shape, jnp.bfloat16))     # src -> dst
    self_edge = (src == dst).astype(jnp.float32)
    has_self = jax.ops.segment_sum(self_edge, src, num_segments=n) > 0
    missing = jnp.where(has_self, 0.0, 1.0)                       # add_remaining_self_loops
    idx = jnp.arange(n)
    a = a.at[idx, idx].add(missing.astype(jnp.bfloat16))

    # Degrees straight from the edge list (no N^2 pass).
    deg = jax.ops.segment_sum(jnp.ones(dst.shape, jnp.float32), dst,
                              num_segments=n) + missing
    d_inv_sqrt = jnp.where(deg > 0, jax.lax.rsqrt(deg), 0.0)      # (n,) f32
    d_col = _pad_to(d_inv_sqrt[:, None], (n_pad, 1)).astype(jnp.float32)

    # First-layer feature transform, pre-scaled with the right D^{-1/2} (N x H, tiny).
    xw = jnp.dot(x.astype(jnp.bfloat16), params["w1"].astype(jnp.bfloat16),
                 preferred_element_type=jnp.float32)
    xw1d = _pad_to((d_inv_sqrt[:, None] * xw).astype(jnp.bfloat16),
                   (n_pad, h_pad))

    w2 = _pad_to(params["w2"], (h_pad, h_pad)).astype(jnp.bfloat16)
    w3 = _pad_to(params["w3"], (h_pad, c_pad)).astype(jnp.bfloat16)
    b1 = _pad_to(params["b1"].reshape(1, -1), (1, h_pad)).astype(jnp.float32)
    b2 = _pad_to(params["b2"].reshape(1, -1), (1, h_pad)).astype(jnp.float32)
    b3 = _pad_to(params["b3"].reshape(1, -1), (1, c_pad),
                 fill=-1e30).astype(jnp.float32)   # padded classes: softmax mass 0

    ops = dict(a=a, d=d_col, xw1d=xw1d, w2=w2, w3=w3, b1=b1, b2=b2, b3=b3)
    meta = (n, c, n_pad, h_pad, c_pad)
    return ops, meta


# ------------------------------ forward ------------------------------

def noisy_clf_forward(params, x, edge_index):
    ops, (n, c, n_pad, h_pad, c_pad) = _prepare_padded_inputs(params, x, edge_index)
    tile = _pick_tile(n_pad)
    grid = (n_pad // tile,)
    vmem = _vmem_limit_bytes(tile, n_pad, h_pad, c_pad)

    a_spec = pl.BlockSpec((tile, n_pad), lambda i: (i, 0))   # streamed row tiles of A
    d_spec = pl.BlockSpec((tile, 1), lambda i: (i, 0))

    def full(shape):
        # constant block index -> DMA'd once, stays resident across grid steps
        return pl.BlockSpec(shape, lambda i: (0, 0))

    cparams = pltpu.CompilerParams(dimension_semantics=("parallel",),
                                   vmem_limit_bytes=vmem)

    # ---- GCNConv1 + relu (pre-scaled for layer 2) ----
    h1s = pl.pallas_call(
        gcn_layer1_kernel,
        out_shape=jax.ShapeDtypeStruct((n_pad, h_pad), jnp.bfloat16),
        grid=grid,
        in_specs=[a_spec, full((n_pad, h_pad)), d_spec, full((1, h_pad))],
        out_specs=pl.BlockSpec((tile, h_pad), lambda i: (i, 0)),
        compiler_params=cparams,
        cost_estimate=pl.CostEstimate(
            flops=2 * n_pad * n_pad * h_pad,
            transcendentals=0,
            bytes_accessed=2 * (n_pad * n_pad + 2 * n_pad * h_pad) + 4 * n_pad),
    )(ops["a"], ops["xw1d"], ops["d"], ops["b1"])

    # ---- GCNConv2 + relu + Linear + softmax ----
    out = pl.pallas_call(
        gcn_layer2_softmax_kernel,
        out_shape=jax.ShapeDtypeStruct((n_pad, c_pad), jnp.bfloat16),
        grid=grid,
        in_specs=[a_spec, full((n_pad, h_pad)), d_spec, full((h_pad, h_pad)),
                  full((1, h_pad)), full((h_pad, c_pad)), full((1, c_pad))],
        out_specs=pl.BlockSpec((tile, c_pad), lambda i: (i, 0)),
        compiler_params=cparams,
        cost_estimate=pl.CostEstimate(
            flops=(2 * n_pad * n_pad * h_pad + 2 * n_pad * h_pad * h_pad
                   + 2 * n_pad * h_pad * c_pad),
            transcendentals=n_pad * c_pad,
            bytes_accessed=2 * (n_pad * n_pad + 2 * n_pad * h_pad
                                + h_pad * h_pad + h_pad * c_pad
                                + n_pad * c_pad)),
    )(ops["a"], h1s, ops["d"], ops["w2"], ops["b2"], ops["w3"], ops["b3"])

    return out[:n, :c].astype(jnp.float32)


# ------------------------------ params ------------------------------

def init_params(key, input_dim, clf_dim, num_classes=2):
    ks = jax.random.split(key, 3)

    def glorot(k, shape):
        fan_in, fan_out = shape
        lim = jnp.sqrt(6.0 / (fan_in + fan_out))
        return jax.random.uniform(k, shape, jnp.float32, -lim, lim)

    return {
        "w1": glorot(ks[0], (input_dim, clf_dim)),
        "b1": jnp.zeros((clf_dim,), jnp.float32),
        "w2": glorot(ks[1], (clf_dim, clf_dim)),
        "b2": jnp.zeros((clf_dim,), jnp.float32),
        "w3": glorot(ks[2], (clf_dim, num_classes)),
        "b3": jnp.zeros((num_classes,), jnp.float32),
    }


# ------------------------------ references ------------------------------

def reference_mirror(params, x, edge_index):
    """Same factorization / cast points as the kernels, in plain jnp."""
    ops, (n, c, _, _, _) = _prepare_padded_inputs(params, x, edge_index)
    a, d = ops["a"], ops["d"]
    t = jnp.dot(a, ops["xw1d"], preferred_element_type=jnp.float32)
    h1s = (jnp.maximum(t * d + ops["b1"], 0.0) * d).astype(jnp.bfloat16)
    t = jnp.dot(a, h1s, preferred_element_type=jnp.float32).astype(jnp.bfloat16)
    t = jnp.dot(t, ops["w2"], preferred_element_type=jnp.float32)
    h2 = jnp.maximum(t * d + ops["b2"], 0.0).astype(jnp.bfloat16)
    logits = jnp.dot(h2, ops["w3"], preferred_element_type=jnp.float32) + ops["b3"]
    return jax.nn.softmax(logits, axis=-1)[:n, :c]


def gcn_norm_dense(edge_index, num_nodes):
    src, dst = edge_index[0], edge_index[1]
    a = jnp.zeros((num_nodes, num_nodes), jnp.float32)
    a = a.at[dst, src].add(1.0)
    has_self = jnp.diag(a) > 0
    a = a + jnp.diag(jnp.where(has_self, 0.0, 1.0))
    deg = jnp.sum(a, axis=1)
    d_inv_sqrt = jnp.where(deg > 0, jax.lax.rsqrt(deg), 0.0)
    return d_inv_sqrt[:, None] * a * d_inv_sqrt[None, :]


def reference_f32(params, x, edge_index):
    """Pure-f32 PyTorch-semantics reference."""
    a = gcn_norm_dense(edge_index, x.shape[0])
    h = jnp.maximum(a @ (x @ params["w1"]) + params["b1"], 0.0)
    h = jnp.maximum(a @ (h @ params["w2"]) + params["b2"], 0.0)
    return jax.nn.softmax(h @ params["w3"] + params["b3"], axis=-1)


# ------------------------------ main ------------------------------

if __name__ == "__main__":
    key = jax.random.PRNGKey(0)
    N, INPUT_DIM, CLF_DIM = 300, 32, 32     # args.input_dim = args.clf_dim = 32
    # N=300 -> N_pad=384 -> 3 row tiles: exercises the streamed/tiled grid path.
    # TODO(synk): performance claims should be validated at N >= 1k with xprof
    # trace minimums; at this demo size the kernels are pure launch latency.

    k_x, k_e, k_p = jax.random.split(key, 3)
    x = jax.random.normal(k_x, (N, INPUT_DIM), jnp.float32)

    E = 900
    src = jax.random.randint(k_e, (E,), 0, N)
    dst = jax.random.randint(jax.random.fold_in(k_e, 1), (E,), 0, N)
    edge_index = jnp.stack([jnp.concatenate([src, dst]),
                            jnp.concatenate([dst, src])], axis=0)   # [2, 2E]

    params = init_params(k_p, INPUT_DIM, CLF_DIM)

    fwd = jax.jit(noisy_clf_forward)
    preds = jax.block_until_ready(fwd(params, x, edge_index))

    assert preds.shape == (N, 2)

    # tight check against a reference with identical factorization / cast points
    ref_m = reference_mirror(params, x, edge_index)
    assert jnp.allclose(preds, ref_m, atol=5e-3, rtol=5e-3), \
        float(jnp.max(jnp.abs(preds - ref_m)))

    # loose check against the pure-f32 PyTorch-semantics reference
    ref32 = reference_f32(params, x, edge_index)
    assert jnp.allclose(preds, ref32, atol=5e-2), \
        float(jnp.max(jnp.abs(preds - ref32)))

    # softmax rows sum to ~1 (bf16 output + approx reciprocal allow small slack)
    assert jnp.allclose(jnp.sum(preds, axis=-1), 1.0, atol=1e-2)

    print("KERNEL_OK")
</pallas_src>

<mosaic_0001>
module attributes {stable_mosaic.version = 11 : i64} {
  func.func @gcn_layer1_kernel(%arg0: i32, %arg1: memref<128x384xbf16, #tpu.memory_space<vmem>>, %arg2: memref<384x128xbf16, #tpu.memory_space<vmem>>, %arg3: memref<128x1xf32, #tpu.memory_space<vmem>>, %arg4: memref<1x128xf32, #tpu.memory_space<vmem>>, %arg5: memref<128x128xbf16, #tpu.memory_space<vmem>>) attributes {dimension_semantics = [#tpu.dimension_semantics<parallel>], iteration_bounds = array<i64: 3>, scalar_prefetch = 0 : i64, scratch_operands = 0 : i64, tpu.core_type = #tpu.core_type<tc>, window_params = [{transform_indices = @transform_0, window_bounds = array<i64: 128, 384>}, {pipeline_mode = #tpu.pipeline_mode<synchronous>, transform_indices = @transform_1, window_bounds = array<i64: 384, 128>}, {transform_indices = @transform_2, window_bounds = array<i64: 128, 1>}, {pipeline_mode = #tpu.pipeline_mode<synchronous>, transform_indices = @transform_3, window_bounds = array<i64: 1, 128>}, {transform_indices = @transform_4, window_bounds = array<i64: 128, 128>}]} {
    %c0 = arith.constant 0 : index
    %c0_0 = arith.constant 0 : index
    %0 = vector.load %arg1[%c0, %c0_0] : memref<128x384xbf16, #tpu.memory_space<vmem>>, vector<128x384xbf16>
    %c0_1 = arith.constant 0 : index
    %c0_2 = arith.constant 0 : index
    %1 = vector.load %arg2[%c0_1, %c0_2] : memref<384x128xbf16, #tpu.memory_space<vmem>>, vector<384x128xbf16>
    %cst = arith.constant dense<0.000000e+00> : vector<128x128xf32>
    %2 = tpu.matmul %0, %1, %cst {dimension_numbers = #tpu.dot_dimension_numbers<[1], [0], [0], [1], [0, 0, 1, 1], [], []>} : vector<128x384xbf16>, vector<384x128xbf16>, vector<128x128xf32> -> vector<128x128xf32>
    %c0_3 = arith.constant 0 : index
    %c0_4 = arith.constant 0 : index
    %3 = vector.load %arg3[%c0_3, %c0_4] : memref<128x1xf32, #tpu.memory_space<vmem>>, vector<128x1xf32>
    %4 = vector.broadcast %3 : vector<128x1xf32> to vector<128x128xf32>
    %5 = arith.mulf %2, %4 : vector<128x128xf32>
    %c0_5 = arith.constant 0 : index
    %c0_6 = arith.constant 0 : index
    %6 = vector.load %arg4[%c0_5, %c0_6] : memref<1x128xf32, #tpu.memory_space<vmem>>, vector<1x128xf32>
    %7 = vector.broadcast %6 : vector<1x128xf32> to vector<128x128xf32>
    %8 = arith.addf %5, %7 : vector<128x128xf32>
    %cst_7 = arith.constant 0.000000e+00 : f32
    %9 = vector.broadcast %cst_7 : f32 to vector<128x128xf32>
    %10 = arith.maximumf %8, %9 : vector<128x128xf32>
    %11 = vector.broadcast %3 : vector<128x1xf32> to vector<128x128xf32>
    %12 = arith.mulf %10, %11 : vector<128x128xf32>
    %13 = arith.truncf %12 : vector<128x128xf32> to vector<128x128xbf16>
    %c0_8 = arith.constant 0 : index
    %c0_9 = arith.constant 0 : index
    %14 = vector.load %arg5[%c0_8, %c0_9] : memref<128x128xbf16, #tpu.memory_space<vmem>>, vector<128x128xbf16>
    tpu.vector_store %arg5[%c0_8, %c0_9], %13 {strides = array<i32>} : memref<128x128xbf16, #tpu.memory_space<vmem>>, vector<128x128xbf16>,
    return
  }
  func.func @transform_0(%arg0: i32) -> (i32, i32) {
    %c0_i32 = arith.constant 0 : i32
    %c0_i32_0 = arith.constant 0 : i32
    return %arg0, %c0_i32 : i32, i32
  }
  func.func @transform_1(%arg0: i32) -> (i32, i32) {
    %c0_i32 = arith.constant 0 : i32
    %c0_i32_0 = arith.constant 0 : i32
    %c0_i32_1 = arith.constant 0 : i32
    return %c0_i32, %c0_i32_0 : i32, i32
  }
  func.func @transform_2(%arg0: i32) -> (i32, i32) {
    %c0_i32 = arith.constant 0 : i32
    %c0_i32_0 = arith.constant 0 : i32
    return %arg0, %c0_i32 : i32, i32
  }
  func.func @transform_3(%arg0: i32) -> (i32, i32) {
    %c0_i32 = arith.constant 0 : i32
    %c0_i32_0 = arith.constant 0 : i32
    %c0_i32_1 = arith.constant 0 : i32
    return %c0_i32, %c0_i32_0 : i32, i32
  }
  func.func @transform_4(%arg0: i32) -> (i32, i32) {
    %c0_i32 = arith.constant 0 : i32
    %c0_i32_0 = arith.constant 0 : i32
    return %arg0, %c0_i32 : i32, i32
  }
}

module attributes {stable_mosaic.version = 11 : i64} {
  func.func @gcn_layer2_softmax_kernel(%arg0: i32, %arg1: memref<128x384xbf16, #tpu.memory_space<vmem>>, %arg2: memref<384x128xbf16, #tpu.memory_space<vmem>>, %arg3: memref<128x1xf32, #tpu.memory_space<vmem>>, %arg4: memref<128x128xbf16, #tpu.memory_space<vmem>>, %arg5: memref<1x128xf32, #tpu.memory_space<vmem>>, %arg6: memref<128x128xbf16, #tpu.memory_space<vmem>>, %arg7: memref<1x128xf32, #tpu.memory_space<vmem>>, %arg8: memref<128x128xbf16, #tpu.memory_space<vmem>>) attributes {dimension_semantics = [#tpu.dimension_semantics<parallel>], iteration_bounds = array<i64: 3>, scalar_prefetch = 0 : i64, scratch_operands = 0 : i64, tpu.core_type = #tpu.core_type<tc>, window_params = [{transform_indices = @transform_0, window_bounds = array<i64: 128, 384>}, {pipeline_mode = #tpu.pipeline_mode<synchronous>, transform_indices = @transform_1, window_bounds = array<i64: 384, 128>}, {transform_indices = @transform_2, window_bounds = array<i64: 128, 1>}, {pipeline_mode = #tpu.pipeline_mode<synchronous>, transform_indices = @transform_3, window_bounds = array<i64: 128, 128>}, {pipeline_mode = #tpu.pipeline_mode<synchronous>, transform_indices = @transform_4, window_bounds = array<i64: 1, 128>}, {pipeline_mode = #tpu.pipeline_mode<synchronous>, transform_indices = @transform_5, window_bounds = array<i64: 128, 128>}, {pipeline_mode = #tpu.pipeline_mode<synchronous>, transform_indices = @transform_6, window_bounds = array<i64: 1, 128>}, {transform_indices = @transform_7, window_bounds = array<i64: 128, 128>}]} {
    %c0 = arith.constant 0 : index
    %c0_0 = arith.constant 0 : index
    %0 = vector.load %arg1[%c0, %c0_0] : memref<128x384xbf16, #tpu.memory_space<vmem>>, vector<128x384xbf16>
    %c0_1 = arith.constant 0 : index
    %c0_2 = arith.constant 0 : index
    %1 = vector.load %arg2[%c0_1, %c0_2] : memref<384x128xbf16, #tpu.memory_space<vmem>>, vector<384x128xbf16>
    %cst = arith.constant dense<0.000000e+00> : vector<128x128xf32>
    %2 = tpu.matmul %0, %1, %cst {dimension_numbers = #tpu.dot_dimension_numbers<[1], [0], [0], [1], [0, 0, 1, 1], [], []>} : vector<128x384xbf16>, vector<384x128xbf16>, vector<128x128xf32> -> vector<128x128xf32>
    %3 = arith.truncf %2 : vector<128x128xf32> to vector<128x128xbf16>
    %c0_3 = arith.constant 0 : index
    %c0_4 = arith.constant 0 : index
    %4 = vector.load %arg4[%c0_3, %c0_4] : memref<128x128xbf16, #tpu.memory_space<vmem>>, vector<128x128xbf16>
    %cst_5 = arith.constant dense<0.000000e+00> : vector<128x128xf32>
    %5 = tpu.matmul %3, %4, %cst_5 {dimension_numbers = #tpu.dot_dimension_numbers<[1], [0], [0], [1], [0, 0, 1, 1], [], []>} : vector<128x128xbf16>, vector<128x128xbf16>, vector<128x128xf32> -> vector<128x128xf32>
    %c0_6 = arith.constant 0 : index
    %c0_7 = arith.constant 0 : index
    %6 = vector.load %arg3[%c0_6, %c0_7] : memref<128x1xf32, #tpu.memory_space<vmem>>, vector<128x1xf32>
    %7 = vector.broadcast %6 : vector<128x1xf32> to vector<128x128xf32>
    %8 = arith.mulf %5, %7 : vector<128x128xf32>
    %c0_8 = arith.constant 0 : index
    %c0_9 = arith.constant 0 : index
    %9 = vector.load %arg5[%c0_8, %c0_9] : memref<1x128xf32, #tpu.memory_space<vmem>>, vector<1x128xf32>
    %10 = vector.broadcast %9 : vector<1x128xf32> to vector<128x128xf32>
    %11 = arith.addf %8, %10 : vector<128x128xf32>
    %cst_10 = arith.constant 0.000000e+00 : f32
    %12 = vector.broadcast %cst_10 : f32 to vector<128x128xf32>
    %13 = arith.maximumf %11, %12 : vector<128x128xf32>
    %14 = arith.truncf %13 : vector<128x128xf32> to vector<128x128xbf16>
    %c0_11 = arith.constant 0 : index
    %c0_12 = arith.constant 0 : index
    %15 = vector.load %arg6[%c0_11, %c0_12] : memref<128x128xbf16, #tpu.memory_space<vmem>>, vector<128x128xbf16>
    %cst_13 = arith.constant dense<0.000000e+00> : vector<128x128xf32>
    %16 = tpu.matmul %14, %15, %cst_13 {dimension_numbers = #tpu.dot_dimension_numbers<[1], [0], [0], [1], [0, 0, 1, 1], [], []>} : vector<128x128xbf16>, vector<128x128xbf16>, vector<128x128xf32> -> vector<128x128xf32>
    %c0_14 = arith.constant 0 : index
    %c0_15 = arith.constant 0 : index
    %17 = vector.load %arg7[%c0_14, %c0_15] : memref<1x128xf32, #tpu.memory_space<vmem>>, vector<1x128xf32>
    %18 = vector.broadcast %17 : vector<1x128xf32> to vector<128x128xf32>
    %19 = arith.addf %16, %18 : vector<128x128xf32>
    %cst_16 = arith.constant dense<0xFF800000> : vector<128xf32>
    %20 = vector.multi_reduction <maximumf>, %19, %cst_16 [1] : vector<128x128xf32> to vector<128xf32>
    %21 = vector.shape_cast %20 : vector<128xf32> to vector<128x1xf32>
    %22 = vector.broadcast %21 : vector<128x1xf32> to vector<128x128xf32>
    %23 = arith.subf %19, %22 : vector<128x128xf32>
    %24 = math.exp %23 : vector<128x128xf32>
    %cst_17 = arith.constant dense<0.000000e+00> : vector<128xf32>
    %25 = vector.multi_reduction <add>, %24, %cst_17 [1] : vector<128x128xf32> to vector<128xf32>
    %26 = vector.shape_cast %25 : vector<128xf32> to vector<128x1xf32>
    %27 = tpu.reciprocal %26 {approx = true} : vector<128x1xf32> -> vector<128x1xf32>
    %28 = vector.broadcast %27 : vector<128x1xf32> to vector<128x128xf32>
    %29 = arith.mulf %24, %28 : vector<128x128xf32>
    %30 = arith.truncf %29 : vector<128x128xf32> to vector<128x128xbf16>
    %c0_18 = arith.constant 0 : index
    %c0_19 = arith.constant 0 : index
    %31 = vector.load %arg8[%c0_18, %c0_19] : memref<128x128xbf16, #tpu.memory_space<vmem>>, vector<128x128xbf16>
    tpu.vector_store %arg8[%c0_18, %c0_19], %30 {strides = array<i32>} : memref<128x128xbf16, #tpu.memory_space<vmem>>, vector<128x128xbf16>,
    return
  }
  func.func @transform_0(%arg0: i32) -> (i32, i32) {
    %c0_i32 = arith.constant 0 : i32
    %c0_i32_0 = arith.constant 0 : i32
    return %arg0, %c0_i32 : i32, i32
  }
  func.func @transform_1(%arg0: i32) -> (i32, i32) {
    %c0_i32 = arith.constant 0 : i32
    %c0_i32_0 = arith.constant 0 : i32
    %c0_i32_1 = arith.constant 0 : i32
    return %c0_i32, %c0_i32_0 : i32, i32
  }
  func.func @transform_2(%arg0: i32) -> (i32, i32) {
    %c0_i32 = arith.constant 0 : i32
    %c0_i32_0 = arith.constant 0 : i32
    return %arg0, %c0_i32 : i32, i32
  }
  func.func @transform_3(%arg0: i32) -> (i32, i32) {
    %c0_i32 = arith.constant 0 : i32
    %c0_i32_0 = arith.constant 0 : i32
    %c0_i32_1 = arith.constant 0 : i32
    return %c0_i32, %c0_i32_0 : i32, i32
  }
  func.func @transform_4(%arg0: i32) -> (i32, i32) {
    %c0_i32 = arith.constant 0 : i32
    %c0_i32_0 = arith.constant 0 : i32
    %c0_i32_1 = arith.constant 0 : i32
    return %c0_i32, %c0_i32_0 : i32, i32
  }
  func.func @transform_5(%arg0: i32) -> (i32, i32) {
    %c0_i32 = arith.constant 0 : i32
    %c0_i32_0 = arith.constant 0 : i32
    %c0_i32_1 = arith.constant 0 : i32
    return %c0_i32, %c0_i32_0 : i32, i32
  }
  func.func @transform_6(%arg0: i32) -> (i32, i32) {
    %c0_i32 = arith.constant 0 : i32
    %c0_i32_0 = arith.constant 0 : i32
    %c0_i32_1 = arith.constant 0 : i32
    return %c0_i32, %c0_i32_0 : i32, i32
  }
  func.func @transform_7(%arg0: i32) -> (i32, i32) {
    %c0_i32 = arith.constant 0 : i32
    %c0_i32_0 = arith.constant 0 : i32
    return %arg0, %c0_i32 : i32, i32
  }
}

</mosaic_0001>

<bundles_post_ra>
// kernel: noisy_clf_forward.2
= control target key start
LH: loop header
LB: loop body
LE: loop exit
PB: predicated region body
PF: predicated region fallthrough
CT: control target
= control target key end

     0   :  { %s1361_s15 = smov 0   ;;  %s1636_s0 = inlined_call_operand.vmem [shape: bf16[384,384], index: 0, kind: input, shape index: {}]   ;;  %s1637_s1 = inlined_call_operand.vmem [shape: bf16[384,128], index: 1, kind: input, shape index: {}]   ;;  %s1638_s2 = inlined_call_operand.vmem [shape: f32[384,1], index: 2, kind: input, shape index: {}]   ;;  %s1639_s3 = inlined_call_operand.vmem [shape: f32[1,128], index: 3, kind: input, shape index: {}]   ;;  %s1640_s4 = inlined_call_operand.vmem [shape: bf16[384,128], index: 4, kind: output, shape index: {}]  }
   0x1 LB: > { %s989_s16 = sadd.s32 4294967295, %s1333_s15   ;;  %p993_p0 = scmp.ge.s32.totalorder %s1333_s15, 1  ;;  %s1333_s15 = sphi %s1361_s15, %s14_s15  }
   0x2   : > { %p175_p1 = scmp.lt.s32.totalorder %s1333_s15, 4 }
   0x4   : > { %p176_p2 = pnand %p993_p0, %p175_p1 }
   0x5   : > { %s994_s29 = sshll.u32 (!%p176_p2), %s989_s16, 4 }
   0x6   : > { %179 = sbr.rel (%p176_p2) target bundleno = 278 (0x116), region = 36  ;;  %p208_p3 = scmp.lt.s32.totalorder (!%p176_p2), %s994_s29, 47 }
   0xb   : > { %v1225_v0 = vld [vmem:[%s1637_s1 + $0x38] sm:$0xff]  ;;  %v1224_v3 = vld [vmem:[%s1637_s1 + $0x30] sm:$0xff]  ;;  %v1223_v6 = vld [vmem:[%s1637_s1 + $0x28] sm:$0xff]  ;;  %s1642_s29 = smov (!%p208_p3, %s994_s29), 47  ;;  %v1335_v19 = vmov 0  }
   0xc   : > { %v1375_v1 = vld [vmem:[%s1637_s1 + $0x78] sm:$0xff]  ;;  %578 = vmatpush.bf16.msra.mxu0 %v1225_v0  ;;  %1289 = vmatpush.bf16.msra.mxu3 %v1225_v0  ;;  %v1390_v4 = vld [vmem:[%s1637_s1 + $0x70] sm:$0xff]  ;;  %v1405_v7 = vld [vmem:[%s1637_s1 + $0x68] sm:$0xff]  ;;  %s997_s17 = sshll.u32 %s1642_s29, 3  ;;  %s1313_s30 = smul.u32 12, %s1642_s29 }
   0xd   : > { %v1380_v2 = vld [vmem:[%s1637_s1 + $0xb8] sm:$0xff]  ;;  %627 = vmatpush.bf16.msra.mxu1 %v1375_v1  ;;  %v1395_v5 = vld [vmem:[%s1637_s1 + $0xb0] sm:$0xff]  ;;  %v1410_v8 = vld [vmem:[%s1637_s1 + $0xa8] sm:$0xff]  ;;  %s1448_s26 = scalar_lea.vmem %s1638_s2, %s997_s17  ;;  %1323 = vset.pattern.permute.xlu0 %v1335_v19  ;;  %s999_s27 = sshll.u32 %s1642_s29, 2 }
   0xe   : > { %676 = vmatpush.bf16.msra.mxu2 %v1380_v2  ;;  %v1222_v9 = vld [vmem:[%s1637_s1 + $0x20] sm:$0xff]  ;;  %v1221_v12 = vld [vmem:[%s1637_s1 + $0x18] sm:$0xff]  ;;  %v1220_v15 = vld [vmem:[%s1637_s1 + $0x10] sm:$0xff]  ;;  %1324 = vset.pattern.permute.xlu1 %v1335_v19  ;;  %s1473_s13 = scalar_lea.vmem %s1636_s0, %s1313_s30  ;;  %s1596_s5 = scalar_lea.vmem %s1640_s4, %s999_s27 }
   0xf   : > { %v1422_v10 = vld [vmem:[%s1637_s1 + $0x60] sm:$0xff]  ;;  %v1438_v13 = vld [vmem:[%s1637_s1 + $0x58] sm:$0xff]  ;;  %v1460_v17 = vld [vmem:[%s1637_s1 + $0x50] sm:$0xff]  ;;  %1325 = vset.pattern.permute.xlu2 %v1335_v19 }
  0x10   : > { %579 = vmatpush.bf16.msra.mxu0 %v1224_v3  ;;  %1290 = vmatpush.bf16.msra.mxu3 %v1224_v3  ;;  %v1427_v11 = vld [vmem:[%s1637_s1 + $0xa0] sm:$0xff]  ;;  %v1443_v14 = vld [vmem:[%s1637_s1 + $0x98] sm:$0xff]  ;;  %v1465_v18 = vld [vmem:[%s1637_s1 + $0x90] sm:$0xff] }
  0x11   : > { %628 = vmatpush.bf16.msra.mxu1 %v1390_v4  ;;  %v725_v16 = vld [vmem:[%s1448_s26] sm:$0xff]  ;;  %v1219_v20 = vld [vmem:[%s1637_s1 + $0x8] sm:$0xff]  ;;  %v1074_v28 = vld [vmem:[%s1473_s13 + $0x90] sm:$0xf] }
  0x12   : > { %677 = vmatpush.bf16.msra.mxu2 %v1395_v5  ;;  %743 = vperm.xlu0 %1323, %v725_v16   ;;  %v1227_v21 = vld [vmem:[%s1637_s1 + $0x48] sm:$0xff]  ;;  %v1218_v23 = vld [vmem:[%s1637_s1] sm:$0xff]  ;;  %v1213_v29 = vld [vmem:[%s1473_s13 + $0x98] sm:$0xf0] }
  0x13   : > { %v1483_v22 = vld [vmem:[%s1637_s1 + $0x88] sm:$0xff]  ;;  %v1491_v24 = vld [vmem:[%s1637_s1 + $0x40] sm:$0xff]  ;;  %v1004_v32 = vld [vmem:[%s1473_s13 + $0xc] sm:$0xf0]  ;;  %v1075_v36 = vor.u32 %v1213_v29, %v1074_v28 }
  0x14   : > { %580 = vmatpush.bf16.msra.mxu0 %v1223_v6  ;;  %1291 = vmatpush.bf16.msra.mxu3 %v1223_v6  ;;  %v1496_v25 = vld [vmem:[%s1637_s1 + $0x80] sm:$0xff]  ;;  %v1195_v27 = vld [vmem:[%s1473_s13 + $0x8] sm:$0xf0]  ;;  %v1010_v33 = vld [vmem:[%s1473_s13 + $0x8] sm:$0xf] }
  0x15   : > { %629 = vmatpush.bf16.msra.mxu1 %v1405_v7  ;;  %v1002_v26 = vld [vmem:[%s1473_s13] sm:$0xf]  ;;  %v1194_v30 = vld [vmem:[%s1473_s13 + $0x4] sm:$0xf]  ;;  %v726_v31 = vld [vmem:[%s1448_s26 + $0x8] sm:$0xff] }
  0x16   : > { %678 = vmatpush.bf16.msra.mxu2 %v1410_v8  ;;  %v1196_v34 = vld [vmem:[%s1473_s13 + $0x10] sm:$0xf0]  ;;  %v1003_v35 = vor.u32 %v1195_v27, %v1002_v26  ;;  %v1007_v37 = vor.u32 %v1194_v30, %v1004_v32  ;;  %v728_v41 = vld [vmem:[%s1448_s26 + $0x18] sm:$0xff]  ;;  %v1198_v43 = vld [vmem:[%s1473_s13 + $0x20] sm:$0xf0] }
  0x17   : > { %v1011_v38 = vor.u32 %v1196_v34, %v1010_v33  ;;  %v727_v39 = vld [vmem:[%s1448_s26 + $0x10] sm:$0xff]  ;;  %v1014_v42 = vld [vmem:[%s1473_s13 + $0x18] sm:$0xf]  ;;  %v1086_v44 = vld [vmem:[%s1473_s13 + $0xa8] sm:$0xf] }
  0x18   : > { %581 = vmatpush.bf16.msra.mxu0 %v1222_v9  ;;  %1292 = vmatpush.bf16.msra.mxu3 %v1222_v9  ;;  %v731_v40 = vld [vmem:[%s1448_s26 + $0x30] sm:$0xff]  ;;  %v1197_v46 = vld [vmem:[%s1473_s13 + $0x1c] sm:$0xf]  ;;  %v1016_v47 = vld [vmem:[%s1473_s13 + $0x24] sm:$0xf0]  ;;  %v1015_v50 = vor.u32 %v1198_v43, %v1014_v42 }
  0x19   : > { %630 = vmatpush.bf16.msra.mxu1 %v1422_v10  ;;  %753 = vperm.xlu1 %1324, %v727_v39   ;;  %v1216_v45 = vld [vmem:[%s1473_s13 + $0xb0] sm:$0xf0]  ;;  %v1022_v48 = vld [vmem:[%s1473_s13 + $0x20] sm:$0xf]  ;;  %v1199_v49 = vld [vmem:[%s1473_s13 + $0x28] sm:$0xf0]  ;;  %v1019_v52 = vor.u32 %v1197_v46, %v1016_v47 }
  0x1a   : > { %679 = vmatpush.bf16.msra.mxu2 %v1427_v11  ;;  %748 = vperm.xlu0 %1323, %v726_v31   ;;  %v1087_v51 = vor.u32 %v1216_v45, %v1086_v44  ;;  %v1023_v53 = vor.u32 %v1199_v49, %v1022_v48  ;;  %v734_v54 = vld [vmem:[%s1448_s26 + $0x48] sm:$0xff]  ;;  %v732_v55 = vld [vmem:[%s1448_s26 + $0x38] sm:$0xff]  ;;  %v737_v56 = vld [vmem:[%s1448_s26 + $0x60] sm:$0xff] }
  0x1b   : > { %v1026_v57 = vld [vmem:[%s1473_s13 + $0x30] sm:$0xf]  ;;  %v1201_v58 = vld [vmem:[%s1473_s13 + $0x38] sm:$0xf0]  ;;  %v1200_v59 = vld [vmem:[%s1473_s13 + $0x34] sm:$0xf] }
  0x1c   : > { %582 = vmatpush.bf16.msra.mxu0 %v1221_v12  ;;  %1293 = vmatpush.bf16.msra.mxu3 %v1221_v12  ;;  %v1212_v60 = vld [vmem:[%s1473_s13 + $0x94] sm:$0xf]  ;;  %v1076_v61 = vld [vmem:[%s1473_s13 + $0x9c] sm:$0xf0]  ;;  %v1034_v63 = vld [vmem:[%s1473_s13 + $0x38] sm:$0xf] }
  0x1d   : > { %631 = vmatpush.bf16.msra.mxu1 %v1438_v13  ;;  %v1028_v62 = vld [vmem:[%s1473_s13 + $0x3c] sm:$0xf0]  ;;  %v1202_v0 = vld [vmem:[%s1473_s13 + $0x40] sm:$0xf0]  ;;  %v1079_v3 = vor.u32 %v1212_v60, %v1076_v61  ;;  %v735_v9 = vld [vmem:[%s1448_s26 + $0x50] sm:$0xff] }
  0x1e   : > { %680 = vmatpush.bf16.msra.mxu2 %v1443_v14  ;;  %v1035_v6 = vor.u32 %v1202_v0, %v1034_v63  ;;  %v1038_v12 = vld [vmem:[%s1473_s13 + $0x48] sm:$0xf]  ;;  %v1203_v16 = vld [vmem:[%s1473_s13 + $0x4c] sm:$0xf]  ;;  %v1088_v19 = vld [vmem:[%s1473_s13 + $0xb4] sm:$0xf0] }
  0x1f   : > { %v736_v27 = vld [vmem:[%s1448_s26 + $0x58] sm:$0xff]  ;;  %v1050_v28 = vld [vmem:[%s1473_s13 + $0x60] sm:$0xf]  ;;  %v1207_v29 = vld [vmem:[%s1473_s13 + $0x68] sm:$0xf0] }
  0x20   : > { %583 = vmatpush.bf16.msra.mxu0 %v1220_v15  ;;  %1294 = vmatpush.bf16.msra.mxu3 %v1220_v15  ;;  %v738_v15 = vld [vmem:[%s1448_s26 + $0x68] sm:$0xff]  ;;  %v1206_v30 = vld [vmem:[%s1473_s13 + $0x64] sm:$0xf]  ;;  %v1082_v31 = vld [vmem:[%s1473_s13 + $0x98] sm:$0xf] }
  0x21   : > { %632 = vmatpush.bf16.msra.mxu1 %v1460_v17  ;;  %758 = vperm.xlu1 %1324, %v728_v41   ;;  %v1052_v32 = vld [vmem:[%s1473_s13 + $0x6c] sm:$0xf0]  ;;  %v1058_v33 = vld [vmem:[%s1473_s13 + $0x68] sm:$0xf]  ;;  %v1208_v34 = vld [vmem:[%s1473_s13 + $0x70] sm:$0xf0] }
  0x22   : > { %681 = vmatpush.bf16.msra.mxu2 %v1465_v18  ;;  %773 = vperm.xlu0 %1323, %v731_v40   ;;  %v1209_v39 = vld [vmem:[%s1473_s13 + $0x7c] sm:$0xf]  ;;  %v1094_v40 = vld [vmem:[%s1473_s13 + $0xb0] sm:$0xf]  ;;  %v1064_v42 = vld [vmem:[%s1473_s13 + $0x84] sm:$0xf0] }
  0x23   : > { %v1217_v41 = vld [vmem:[%s1473_s13 + $0xb8] sm:$0xf0]  ;;  %v1070_v43 = vld [vmem:[%s1473_s13 + $0x80] sm:$0xf]  ;;  %v1211_v44 = vld [vmem:[%s1473_s13 + $0x88] sm:$0xf0]  ;;  %v1067_v47 = vor.u32 %v1209_v39, %v1064_v42 }
  0x24   : > { %584 = vmatpush.bf16.msra.mxu0 %v1219_v20  ;;  %1295 = vmatpush.bf16.msra.mxu3 %v1219_v20  ;;  %v1040_v20 = vld [vmem:[%s1473_s13 + $0x54] sm:$0xf0]  ;;  %v1095_v46 = vor.u32 %v1217_v41, %v1094_v40  ;;  %v1071_v48 = vor.u32 %v1211_v44, %v1070_v43 }
  0x25   : > { %633 = vmatpush.bf16.msra.mxu1 %v1227_v21 }
  0x26   : > { %682 = vmatpush.bf16.msra.mxu2 %v1483_v22 }
  0x28   : > { %585 = vmatpush.bf16.msra.mxu0 %v1218_v23  ;;  %1296 = vmatpush.bf16.msra.mxu3 %v1218_v23  ;;  %v1205_v23 = vld [vmem:[%s1473_s13 + $0x58] sm:$0xf0] }
  0x29   : > { %634 = vmatpush.bf16.msra.mxu1 %v1491_v24  ;;  %778 = vperm.xlu1 %1324, %v732_v55  }
  0x2a   : > { %683 = vmatpush.bf16.msra.mxu2 %v1496_v25  ;;  %788 = vperm.xlu0 %1323, %v734_v54  }
  0x2b   : > { %586 = vmatmul.bf16.vlgmr.msra.gmra.mxu0 %v1003_v35  ;;  %616 = vmatmul.bf16.vlgmr.msra.gmra.mxu3 %v1075_v36  ;;  %v1055_v35 = vor.u32 %v1206_v30, %v1052_v32  ;;  %v1059_v36 = vor.u32 %v1208_v34, %v1058_v33 }
  0x2c   : > { %1297 = vmatpush.bf16.msrb.mxu3 %v1375_v1  ;;  %635 = vmatmul.bf16.vlgmr.msra.gmra.mxu1 %v1007_v37  ;;  %v1027_v1 = vor.u32 %v1201_v58, %v1026_v57  ;;  %v739_v37 = vld [vmem:[%s1448_s26 + $0x70] sm:$0xff]  ;;  %v1584_v58 = vld [vmem:[%s1639_s3] ss:$0 sm:$0xff] }
  0x2d   : > { %684 = vmatmul.bf16.vlgmr.msra.gmra.mxu2 %v1011_v38  ;;  %v1210_v38 = vld [vmem:[%s1473_s13 + $0x80] sm:$0xf0] }
  0x30   : > { %1298 = vmatpush.bf16.msrb.mxu3 %v1390_v4  ;;  %v1031_v4 = vor.u32 %v1200_v59, %v1028_v62 }
  0x31   : > { %793 = vperm.xlu1 %1324, %v735_v9  }
  0x32   : > { %803 = vperm.xlu0 %1323, %v737_v56  }
  0x34   : > { %1299 = vmatpush.bf16.msrb.mxu3 %v1405_v7  ;;  %v729_v7 = vld [vmem:[%s1448_s26 + $0x20] sm:$0xff] }
  0x35   : > { %763 = vperm.xlu2 %1325, %v729_v7  }
  0x38   : > { %1300 = vmatpush.bf16.msrb.mxu3 %v1422_v10  ;;  %v740_v10 = vld [vmem:[%s1448_s26 + $0x78] sm:$0xff] }
  0x39   : > { %808 = vperm.xlu1 %1324, %v738_v15  }
  0x3a   : > { %818 = vperm.xlu0 %1323, %v740_v10  }
  0x3b   : > { %591 = vmatmul.bf16.gmra.mxu0 %v1015_v50  ;;  %621 = vmatmul.bf16.gmra.mxu3 %v1087_v51 }
  0x3c   : > { %1301 = vmatpush.bf16.msrb.mxu3 %v1438_v13  ;;  %640 = vmatmul.bf16.gmra.mxu1 %v1019_v52  ;;  %v1204_v13 = vld [vmem:[%s1473_s13 + $0x50] sm:$0xf0] }
  0x3d   : > { %689 = vmatmul.bf16.gmra.mxu2 %v1023_v53 }
  0x40   : > { %1302 = vmatpush.bf16.msrb.mxu3 %v1460_v17  ;;  %v1215_v17 = vld [vmem:[%s1473_s13 + $0xac] sm:$0xf] }
  0x44   : > { %1303 = vmatpush.bf16.msrb.mxu3 %v1227_v21  ;;  %v1046_v21 = vld [vmem:[%s1473_s13 + $0x50] sm:$0xf] }
  0x45   : > { %v1047_v26 = vor.u32 %v1205_v23, %v1046_v21 }
  0x48   : > { %1304 = vmatpush.bf16.msrb.mxu3 %v1491_v24  ;;  %v1043_v24 = vor.u32 %v1203_v16, %v1040_v20 }
  0x4b   : > { %596 = vmatmul.bf16.gmra.mxu0 %v1027_v1  ;;  %665 = vmatmul.bf16.vlgmr.msrb.gmra.mxu3 %v1079_v3 }
  0x4c   : > { %1305 = vmatpush.bf16.msra.mxu3 %v1380_v2  ;;  %645 = vmatmul.bf16.gmra.mxu1 %v1031_v4  ;;  %v730_v2 = vld [vmem:[%s1448_s26 + $0x28] sm:$0xff] }
  0x4d   : > { %694 = vmatmul.bf16.gmra.mxu2 %v1035_v6  ;;  %768 = vperm.xlu2 %1325, %v730_v2  }
  0x50   : > { %1306 = vmatpush.bf16.msra.mxu3 %v1395_v5  ;;  %v1039_v5 = vor.u32 %v1204_v13, %v1038_v12 }
  0x54   : > { %1307 = vmatpush.bf16.msra.mxu3 %v1410_v8  ;;  %v1091_v8 = vor.u32 %v1215_v17, %v1088_v19 }
  0x58   : > { %1308 = vmatpush.bf16.msra.mxu3 %v1427_v11  ;;  %v733_v11 = vld [vmem:[%s1448_s26 + $0x40] sm:$0xff] }
  0x59   : > { %783 = vperm.xlu2 %1325, %v733_v11  }
  0x5b   : > { %601 = vmatmul.bf16.gmra.mxu0 %v1039_v5  ;;  %670 = vmatmul.bf16.gmra.mxu3 %v1091_v8 }
  0x5c   : > { %1309 = vmatpush.bf16.msra.mxu3 %v1443_v14  ;;  %650 = vmatmul.bf16.gmra.mxu1 %v1043_v24  ;;  %v1214_v14 = vld [vmem:[%s1473_s13 + $0xa0] sm:$0xf0] }
  0x5d   : > { %699 = vmatmul.bf16.gmra.mxu2 %v1047_v26 }
  0x60   : > { %1310 = vmatpush.bf16.msra.mxu3 %v1465_v18  ;;  %v1051_v18 = vor.u32 %v1207_v29, %v1050_v28 }
  0x61   : > { %798 = vperm.xlu2 %1325, %v736_v27  }
  0x64   : > { %1311 = vmatpush.bf16.msra.mxu3 %v1483_v22  ;;  %v1083_v22 = vor.u32 %v1214_v14, %v1082_v31 }
  0x68   : > { %1312 = vmatpush.bf16.msra.mxu3 %v1496_v25  ;;  %v1062_v25 = vld [vmem:[%s1473_s13 + $0x78] sm:$0xf] }
  0x69   : > { %813 = vperm.xlu2 %1325, %v739_v37   ;;  %v1063_v45 = vor.u32 %v1210_v38, %v1062_v25 }
  0x6b   : > { %606 = vmatmul.bf16.gmra.mxu0 %v1051_v18  ;;  %714 = vmatmul.bf16.vlgmr.msra.gmra.mxu3 %v1083_v22 }
  0x6c   : > { %655 = vmatmul.bf16.gmra.mxu1 %v1055_v35 }
  0x6d   : > { %704 = vmatmul.bf16.gmra.mxu2 %v1059_v36 }
  0x7b   : > { %611 = vmatmul.bf16.gmra.mxu0 %v1063_v45  ;;  %719 = vmatmul.bf16.gmra.mxu3 %v1095_v46 }
  0x7c   : > { %660 = vmatmul.bf16.gmra.mxu1 %v1067_v47 }
  0x7d   : > { %709 = vmatmul.bf16.gmra.mxu2 %v1071_v48 }
  0x84   : > { %v744_v52 = vpop.permute.xlu0 %743 }
  0x8b   : > { %v754_v2 = vpop.permute.xlu1 %753 }
  0x8c   : > { %v749_v63 = vpop.permute.xlu0 %748 }
  0x8f   : > { %v764_v22 = vpop.permute.xlu2 %763 }
  0x93   : > { %v759_v11 = vpop.permute.xlu1 %758 }
  0xa7   : > { %v769_v48 = vpop.permute.xlu2 %768 }
  0xa8   : > { %v587_v49 = vpop.f32.mrf.mxu0 }
  0xa9   : > { %v636_v50 = vpop.f32.mrf.mxu1 }
  0xaa   : > { %v637_v51 = vadd.f32 %v636_v50, %v587_v49 }
  0xae   : > { %v1579_v53 = vpop.f32.mrf.mxu3 }
  0xb0   : > { %v685_v54 = vpop.f32.mrf.mxu2  ;;  %v589_v56 = vpop.f32.mrf.mxu0 }
  0xb1   : > { %v686_v55 = vadd.f32 %v685_v54, %v637_v51  ;;  %v638_v57 = vpop.f32.mrf.mxu1 }
  0xb2   : > { %v639_v60 = vadd.f32 %v638_v57, %v589_v56 }
  0xb3   : > { %v821_v59 = vmul.f32 %v744_v52, %v686_v55  ;;  %v774_v55 = vpop.permute.xlu0 %773 }
  0xb5   : > { %v841_v0 = vadd.f32 %v1584_v58, %v821_v59 }
  0xb6   : > { %v1586_v61 = vpop.f32.mrf.mxu3 }
  0xb7   : > { %v857_v7 = vmax.f32 %v841_v0, 0.0 }
  0xb8   : > { %v687_v62 = vpop.f32.mrf.mxu2  ;;  %v592_v3 = vpop.f32.mrf.mxu0 }
  0xb9   : > { %v688_v1 = vadd.f32 %v687_v62, %v639_v60  ;;  %v641_v4 = vpop.f32.mrf.mxu1  ;;  %v873_v16 = vmul.f32 %v857_v7, %v744_v52 }
  0xba   : > { %v642_v10 = vadd.f32 %v641_v4, %v592_v3  ;;  %v779_v4 = vpop.permute.xlu1 %778 }
  0xbb   : > { %v822_v6 = vmul.f32 %v749_v63, %v688_v1 }
  0xbd   : > { %v842_v9 = vadd.f32 %v1584_v58, %v822_v6 }
  0xbe   : > { %v1591_v13 = vpop.f32.mrf.mxu3 }
  0xbf   : > { %v858_v12 = vmax.f32 %v842_v9, 0.0 }
  0xc0   : > { %v690_v15 = vpop.f32.mrf.mxu2  ;;  %v594_v20 = vpop.f32.mrf.mxu0 }
  0xc1   : > { %v874_v17 = vmul.f32 %v858_v12, %v749_v63  ;;  %v691_v19 = vadd.f32 %v690_v15, %v642_v10  ;;  %v643_v21 = vpop.f32.mrf.mxu1 }
  0xc2   : > { %v644_v8 = vadd.f32 %v643_v21, %v594_v20 }
  0xc3   : > { %v1245_v23 = vpack.c.bf16 %v874_v17, %v873_v16  ;;  %v823_v5 = vmul.f32 %v754_v2, %v691_v19 }
  0xc5   : > { %1246 = vst [vmem:[%s1596_s5] sm:$0xff] %v1245_v23   ;;  %v843_v27 = vadd.f32 %v1584_v58, %v823_v5 }
  0xc6   : > { %v1599_v24 = vpop.f32.mrf.mxu3 }
  0xc7   : > { %v859_v14 = vmax.f32 %v843_v27, 0.0 }
  0xc8   : > { %v692_v26 = vpop.f32.mrf.mxu2  ;;  %v597_v29 = vpop.f32.mrf.mxu0 }
  0xc9   : > { %v693_v28 = vadd.f32 %v692_v26, %v644_v8  ;;  %v646_v30 = vpop.f32.mrf.mxu1  ;;  %v875_v36 = vmul.f32 %v859_v14, %v754_v2  ;;  %v789_v2 = vpop.permute.xlu0 %788 }
  0xca   : > { %v647_v33 = vadd.f32 %v646_v30, %v597_v29  ;;  %v784_v8 = vpop.permute.xlu2 %783  ;;  %v1612_v26 = vpop.permute.xlu1 %793 }
  0xcb   : > { %v824_v31 = vmul.f32 %v759_v11, %v693_v28 }
  0xcd   : > { %v844_v32 = vadd.f32 %v1584_v58, %v824_v31 }
  0xce   : > { %v666_v18 = vpop.f32.mrf.mxu3 }
  0xcf   : > { %v860_v34 = vmax.f32 %v844_v32, 0.0  ;;  %v667_v5 = vadd.f32 %v666_v18, %v1579_v53 }
  0xd0   : > { %v695_v35 = vpop.f32.mrf.mxu2  ;;  %v599_v38 = vpop.f32.mrf.mxu0 }
  0xd1   : > { %v876_v37 = vmul.f32 %v860_v34, %v759_v11  ;;  %v696_v25 = vadd.f32 %v695_v35, %v647_v33  ;;  %v648_v39 = vpop.f32.mrf.mxu1  ;;  %v804_v34 = vpop.permute.xlu0 %803 }
  0xd2   : > { %v649_v42 = vadd.f32 %v648_v39, %v599_v38 }
  0xd3   : > { %v1250_v40 = vpack.c.bf16 %v876_v37, %v875_v36  ;;  %v825_v41 = vmul.f32 %v764_v22, %v696_v25 }
  0xd5   : > { %1282 = vst [vmem:[%s1596_s5 + $0x8] sm:$0xff] %v1250_v40   ;;  %v845_v45 = vadd.f32 %v1584_v58, %v825_v41  ;;  %v799_v40 = vpop.permute.xlu2 %798  ;;  %v809_v41 = vpop.permute.xlu1 %808 }
  0xd6   : > { %v668_v43 = vpop.f32.mrf.mxu3 }
  0xd7   : > { %v861_v51 = vmax.f32 %v845_v45, 0.0  ;;  %v669_v37 = vadd.f32 %v668_v43, %v1586_v61 }
  0xd8   : > { %v697_v44 = vpop.f32.mrf.mxu2  ;;  %v602_v47 = vpop.f32.mrf.mxu0 }
  0xd9   : > { %v698_v46 = vadd.f32 %v697_v44, %v649_v42  ;;  %v651_v49 = vpop.f32.mrf.mxu1  ;;  %v877_v60 = vmul.f32 %v861_v51, %v764_v22 }
  0xda   : > { %v652_v54 = vadd.f32 %v651_v49, %v602_v47 }
  0xdb   : > { %v826_v50 = vmul.f32 %v769_v48, %v698_v46 }
  0xdd   : > { %v846_v52 = vadd.f32 %v1584_v58, %v826_v50 }
  0xde   : > { %v671_v57 = vpop.f32.mrf.mxu3 }
  0xdf   : > { %v862_v56 = vmax.f32 %v846_v52, 0.0  ;;  %v672_v52 = vadd.f32 %v671_v57, %v1591_v13 }
  0xe0   : > { %v700_v59 = vpop.f32.mrf.mxu2  ;;  %v604_v0 = vpop.f32.mrf.mxu0 }
  0xe1   : > { %v878_v62 = vmul.f32 %v862_v56, %v769_v48  ;;  %v701_v63 = vadd.f32 %v700_v59, %v652_v54  ;;  %v653_v1 = vpop.f32.mrf.mxu1 }
  0xe2   : > { %v654_v7 = vadd.f32 %v653_v1, %v604_v0 }
  0xe3   : > { %v1255_v3 = vpack.c.bf16 %v878_v62, %v877_v60  ;;  %v827_v6 = vmul.f32 %v774_v55, %v701_v63 }
  0xe5   : > { %1283 = vst [vmem:[%s1596_s5 + $0x10] sm:$0xff] %v1255_v3   ;;  %v847_v12 = vadd.f32 %v1584_v58, %v827_v6  ;;  %v814_v6 = vpop.permute.xlu2 %813 }
  0xe6   : > { %v1607_v9 = vpop.f32.mrf.mxu3 }
  0xe7   : > { %v863_v20 = vmax.f32 %v847_v12, 0.0  ;;  %v674_v57 = vadd.f32 %v1607_v9, %v1599_v24 }
  0xe8   : > { %v702_v10 = vpop.f32.mrf.mxu2  ;;  %v607_v16 = vpop.f32.mrf.mxu0 }
  0xe9   : > { %v703_v15 = vadd.f32 %v702_v10, %v654_v7  ;;  %v656_v17 = vpop.f32.mrf.mxu1  ;;  %v879_v30 = vmul.f32 %v863_v20, %v774_v55 }
  0xea   : > { %v657_v23 = vadd.f32 %v656_v17, %v607_v16 }
  0xeb   : > { %v828_v19 = vmul.f32 %v779_v4, %v703_v15 }
  0xed   : > { %v848_v21 = vadd.f32 %v1584_v58, %v828_v19 }
  0xee   : > { %v715_v27 = vpop.f32.mrf.mxu3 }
  0xef   : > { %v864_v11 = vmax.f32 %v848_v21, 0.0  ;;  %v716_v29 = vadd.f32 %v715_v27, %v667_v5  ;;  %v819_v21 = vpop.permute.xlu0 %818 }
  0xf0   : > { %v705_v28 = vpop.f32.mrf.mxu2  ;;  %v609_v32 = vpop.f32.mrf.mxu0 }
  0xf1   : > { %v880_v31 = vmul.f32 %v864_v11, %v779_v4  ;;  %v706_v14 = vadd.f32 %v705_v28, %v657_v23  ;;  %v658_v33 = vpop.f32.mrf.mxu1  ;;  %v833_v35 = vmul.f32 %v804_v34, %v716_v29 }
  0xf2   : > { %v659_v53 = vadd.f32 %v658_v33, %v609_v32 }
  0xf3   : > { %v1260_v22 = vpack.c.bf16 %v880_v31, %v879_v30  ;;  %v829_v36 = vmul.f32 %v784_v8, %v706_v14  ;;  %v853_v25 = vadd.f32 %v1584_v58, %v833_v35 }
  0xf5   : > { %1284 = vst [vmem:[%s1596_s5 + $0x18] sm:$0xff] %v1260_v22   ;;  %v849_v42 = vadd.f32 %v1584_v58, %v829_v36  ;;  %v869_v49 = vmax.f32 %v853_v25, 0.0 }
  0xf6   : > { %v717_v18 = vpop.f32.mrf.mxu3 }
  0xf7   : > { %v718_v39 = vadd.f32 %v717_v18, %v669_v37  ;;  %v865_v51 = vmax.f32 %v849_v42, 0.0  ;;  %v885_v59 = vmul.f32 %v869_v49, %v804_v34 }
  0xf8   : > { %v707_v38 = vpop.f32.mrf.mxu2  ;;  %v612_v46 = vpop.f32.mrf.mxu0 }
  0xf9   : > { %v708_v44 = vadd.f32 %v707_v38, %v659_v53  ;;  %v834_v45 = vmul.f32 %v809_v41, %v718_v39  ;;  %v661_v47 = vpop.f32.mrf.mxu1  ;;  %v881_v0 = vmul.f32 %v865_v51, %v784_v8 }
  0xfa   : > { %v662_v43 = vadd.f32 %v661_v47, %v612_v46 }
  0xfb   : > { %v830_v48 = vmul.f32 %v789_v2, %v708_v44  ;;  %v854_v50 = vadd.f32 %v1584_v58, %v834_v45 }
  0xfd   : > { %v850_v61 = vadd.f32 %v1584_v58, %v830_v48  ;;  %v870_v54 = vmax.f32 %v854_v50, 0.0 }
  0xfe   : > { %v720_v56 = vpop.f32.mrf.mxu3 }
  0xff   : > { %v866_v55 = vmax.f32 %v850_v61, 0.0  ;;  %v886_v60 = vmul.f32 %v870_v54, %v809_v41  ;;  %v721_v63 = vadd.f32 %v720_v56, %v672_v52 }
 0x100   : > { %v710_v62 = vpop.f32.mrf.mxu2  ;;  %v614_v12 = vpop.f32.mrf.mxu0 }
 0x101   : > { %v882_v1 = vmul.f32 %v866_v55, %v789_v2  ;;  %v711_v3 = vadd.f32 %v710_v62, %v662_v43  ;;  %v1275_v4 = vpack.c.bf16 %v886_v60, %v885_v59  ;;  %v835_v10 = vmul.f32 %v814_v6, %v721_v63  ;;  %v663_v15 = vpop.f32.mrf.mxu1 }
 0x102   : > { %v664_v16 = vadd.f32 %v663_v15, %v614_v12 }
 0x103   : > { %v1265_v7 = vpack.c.bf16 %v882_v1, %v881_v0  ;;  %1287 = vst [vmem:[%s1596_s5 + $0x30] sm:$0xff] %v1275_v4   ;;  %v831_v13 = vmul.f32 %v1612_v26, %v711_v3  ;;  %v855_v19 = vadd.f32 %v1584_v58, %v835_v10 }
 0x105   : > { %1285 = vst [vmem:[%s1596_s5 + $0x20] sm:$0xff] %v1265_v7   ;;  %v851_v23 = vadd.f32 %v1584_v58, %v831_v13  ;;  %v871_v27 = vmax.f32 %v855_v19, 0.0 }
 0x106   : > { %v722_v17 = vpop.f32.mrf.mxu3 }
 0x107   : > { %v723_v2 = vadd.f32 %v722_v17, %v674_v57  ;;  %v867_v29 = vmax.f32 %v851_v23, 0.0  ;;  %v887_v31 = vmul.f32 %v871_v27, %v814_v6 }
 0x108   : > { %v712_v20 = vpop.f32.mrf.mxu2 }
 0x109   : > { %v713_v5 = vadd.f32 %v712_v20, %v664_v16  ;;  %v836_v8 = vmul.f32 %v819_v21, %v723_v2  ;;  %v883_v32 = vmul.f32 %v867_v29, %v1612_v26 }
 0x10b   : > { %v832_v11 = vmul.f32 %v799_v40, %v713_v5  ;;  %v856_v28 = vadd.f32 %v1584_v58, %v836_v8 }
 0x10d   : > { %v852_v24 = vadd.f32 %v1584_v58, %v832_v11  ;;  %v872_v9 = vmax.f32 %v856_v28, 0.0 }
 0x10f   : > { %v868_v30 = vmax.f32 %v852_v24, 0.0  ;;  %v888_v14 = vmul.f32 %v872_v9, %v819_v21 }
 0x111   : > { %v884_v33 = vmul.f32 %v868_v30, %v799_v40  ;;  %v1280_v34 = vpack.c.bf16 %v888_v14, %v887_v31 }
 0x113   : > { %v1270_v22 = vpack.c.bf16 %v884_v33, %v883_v32  ;;  %1288 = vst [vmem:[%s1596_s5 + $0x38] sm:$0xff] %v1280_v34  }
 0x115   : > { %1286 = vst [vmem:[%s1596_s5 + $0x28] sm:$0xff] %v1270_v22  }
 0x116 PF: > { %s14_s15 = sadd.s32 1, %s1333_s15  }
 0x117   : > { %p11_p4 = scmp.ge.s32.totalorder %s14_s15, 5  }
 0x119   :  { %13 = sbr.rel (!%p11_p4) target bundleno = 1 (0x1), region = 69 }

// kernel: noisy_clf_forward.3
= control target key start
LH: loop header
LB: loop body
LE: loop exit
PB: predicated region body
PF: predicated region fallthrough
CT: control target
= control target key end

     0   :  { %s1976_s24 = smov 0   ;;  %s2352_s0 = inlined_call_operand.vmem [shape: bf16[384,384], index: 0, kind: input, shape index: {}]   ;;  %s2353_s1 = inlined_call_operand.vmem [shape: bf16[384,128], index: 1, kind: input, shape index: {}]   ;;  %s2354_s2 = inlined_call_operand.vmem [shape: f32[384,1], index: 2, kind: input, shape index: {}]   ;;  %s2355_s3 = inlined_call_operand.vmem [shape: bf16[128,128], index: 3, kind: input, shape index: {}]   ;;  %s2356_s4 = inlined_call_operand.vmem [shape: f32[1,128], index: 4, kind: input, shape index: {}]   ;;  %s2357_s5 = inlined_call_operand.vmem [shape: bf16[128,128], index: 5, kind: input, shape index: {}]   ;;  %s2358_s6 = inlined_call_operand.vmem [shape: f32[1,128], index: 6, kind: input, shape index: {}]   ;;  %s2359_s7 = inlined_call_operand.vmem [shape: bf16[384,128], index: 7, kind: output, shape index: {}]  }
   0x1 LB: > { %s1444_s25 = sadd.s32 4294967295, %s1933_s24   ;;  %p1448_p0 = scmp.ge.s32.totalorder %s1933_s24, 1  ;;  %s1933_s24 = sphi %s1976_s24, %s17_s24  }
   0x2   : > { %p250_p1 = scmp.lt.s32.totalorder %s1933_s24, 4 }
   0x4   : > { %p251_p2 = pnand %p1448_p0, %p250_p1 }
   0x5   : > { %s1449_s9 = sshll.u32 (!%p251_p2), %s1444_s25, 4 }
   0x6   : > { %254 = sbr.rel (%p251_p2) target bundleno = 870 (0x366), region = 48  ;;  %p289_p3 = scmp.lt.s32.totalorder (!%p251_p2), %s1449_s9, 47 }
   0xb   : > { %v1744_v0 = vld [vmem:[%s2353_s1 + $0x38] sm:$0xff]  ;;  %v1743_v1 = vld [vmem:[%s2353_s1 + $0x30] sm:$0xff]  ;;  %v1742_v2 = vld [vmem:[%s2353_s1 + $0x28] sm:$0xff]  ;;  %s2361_s9 = smov (!%p289_p3, %s1449_s9), 47 }
   0xc   : > { %1824 = vmatpush.bf16.msra.mxu1 %v1744_v0  ;;  %1825 = vmatpush.bf16.msra.mxu2 %v1744_v0  ;;  %v1741_v3 = vld [vmem:[%s2353_s1 + $0x20] sm:$0xff]  ;;  %v1740_v4 = vld [vmem:[%s2353_s1 + $0x18] sm:$0xff]  ;;  %v1739_v5 = vld [vmem:[%s2353_s1 + $0x10] sm:$0xff]  ;;  %s1848_s16 = smul.u32 12, %s2361_s9  ;;  %s1452_s17 = sshll.u32 %s2361_s9, 3 }
   0xd   : > { %659 = vmatpush.bf16.msra.mxu0 %v1744_v0  ;;  %1826 = vmatpush.bf16.msra.mxu3 %v1744_v0  ;;  %v1738_v6 = vld [vmem:[%s2353_s1 + $0x8] sm:$0xff]  ;;  %v1737_v7 = vld [vmem:[%s2353_s1] sm:$0xff]  ;;  %v1760_v12 = vld [vmem:[%s2353_s1 + $0xb8] sm:$0xff]  ;;  %s2111_s20 = scalar_lea.vmem %s2354_s2, %s1452_s17  ;;  %s1454_s14 = sshll.u32 %s2361_s9, 2 }
   0xe   : > { %s2011_s21 = scalar_lea.vmem %s2352_s0, %s1848_s16  ;;  %v1752_v13 = vld [vmem:[%s2353_s1 + $0x78] sm:$0xff]  ;;  %v1759_v18 = vld [vmem:[%s2353_s1 + $0xb0] sm:$0xff]  ;;  %v1758_v21 = vld [vmem:[%s2353_s1 + $0xa8] sm:$0xff]  ;;  %s2325_s16 = scalar_lea.vmem %s2359_s7, %s1454_s14 }
   0xf   : > { %v1481_v8 = vld [vmem:[%s2011_s21 + $0x30] sm:$0xf]  ;;  %v1720_v9 = vld [vmem:[%s2011_s21 + $0x38] sm:$0xf0]  ;;  %v1505_v10 = vld [vmem:[%s2011_s21 + $0x60] sm:$0xf] }
  0x10   : > { %1827 = vmatpush.bf16.msra.mxu1 %v1743_v1  ;;  %1828 = vmatpush.bf16.msra.mxu2 %v1743_v1  ;;  %v1726_v11 = vld [vmem:[%s2011_s21 + $0x68] sm:$0xf0]  ;;  %v1482_v14 = vor.u32 %v1720_v9, %v1481_v8  ;;  %v1457_v16 = vld [vmem:[%s2011_s21] sm:$0xf]  ;;  %v1751_v19 = vld [vmem:[%s2353_s1 + $0x70] sm:$0xff] }
  0x11   : > { %660 = vmatpush.bf16.msra.mxu0 %v1743_v1  ;;  %1829 = vmatpush.bf16.msra.mxu3 %v1743_v1  ;;  %v1506_v15 = vor.u32 %v1726_v11, %v1505_v10  ;;  %v1714_v17 = vld [vmem:[%s2011_s21 + $0x8] sm:$0xf0]  ;;  %v1757_v23 = vld [vmem:[%s2353_s1 + $0xa0] sm:$0xff]  ;;  %v1493_v25 = vld [vmem:[%s2011_s21 + $0x48] sm:$0xf] }
  0x12   : > { %v1458_v20 = vor.u32 %v1714_v17, %v1457_v16  ;;  %v1750_v22 = vld [vmem:[%s2353_s1 + $0x68] sm:$0xff]  ;;  %v1749_v24 = vld [vmem:[%s2353_s1 + $0x60] sm:$0xff]  ;;  %v1723_v26 = vld [vmem:[%s2011_s21 + $0x50] sm:$0xf0] }
  0x13   : > { %v1517_v27 = vld [vmem:[%s2011_s21 + $0x78] sm:$0xf]  ;;  %v1729_v28 = vld [vmem:[%s2011_s21 + $0x80] sm:$0xf0]  ;;  %v1494_v31 = vor.u32 %v1723_v26, %v1493_v25  ;;  %v1755_v35 = vld [vmem:[%s2353_s1 + $0x90] sm:$0xff] }
  0x14   : > { %1830 = vmatpush.bf16.msra.mxu1 %v1742_v2  ;;  %1831 = vmatpush.bf16.msra.mxu2 %v1742_v2  ;;  %v1756_v29 = vld [vmem:[%s2353_s1 + $0x98] sm:$0xff]  ;;  %v1518_v32 = vor.u32 %v1729_v28, %v1517_v27  ;;  %v1717_v34 = vld [vmem:[%s2011_s21 + $0x20] sm:$0xf0]  ;;  %v1747_v36 = vld [vmem:[%s2353_s1 + $0x50] sm:$0xff] }
  0x15   : > { %661 = vmatpush.bf16.msra.mxu0 %v1742_v2  ;;  %1832 = vmatpush.bf16.msra.mxu3 %v1742_v2  ;;  %v1748_v30 = vld [vmem:[%s2353_s1 + $0x58] sm:$0xff]  ;;  %v1754_v38 = vld [vmem:[%s2353_s1 + $0x88] sm:$0xff]  ;;  %v1753_v40 = vld [vmem:[%s2353_s1 + $0x80] sm:$0xff] }
  0x16   : > { %v1469_v33 = vld [vmem:[%s2011_s21 + $0x18] sm:$0xf]  ;;  %v1746_v39 = vld [vmem:[%s2353_s1 + $0x48] sm:$0xff]  ;;  %v1745_v41 = vld [vmem:[%s2353_s1 + $0x40] sm:$0xff] }
  0x17   : > { %v1470_v37 = vor.u32 %v1717_v34, %v1469_v33  ;;  %v1713_v42 = vld [vmem:[%s2011_s21 + $0x4] sm:$0xf]  ;;  %v1459_v43 = vld [vmem:[%s2011_s21 + $0xc] sm:$0xf0]  ;;  %v1465_v44 = vld [vmem:[%s2011_s21 + $0x8] sm:$0xf] }
  0x18   : > { %1833 = vmatpush.bf16.msra.mxu1 %v1741_v3  ;;  %1834 = vmatpush.bf16.msra.mxu2 %v1741_v3  ;;  %v1715_v45 = vld [vmem:[%s2011_s21 + $0x10] sm:$0xf0]  ;;  %v1462_v46 = vor.u32 %v1713_v42, %v1459_v43  ;;  %v1716_v48 = vld [vmem:[%s2011_s21 + $0x1c] sm:$0xf]  ;;  %v1471_v49 = vld [vmem:[%s2011_s21 + $0x24] sm:$0xf0] }
  0x19   : > { %662 = vmatpush.bf16.msra.mxu0 %v1741_v3  ;;  %1835 = vmatpush.bf16.msra.mxu3 %v1741_v3  ;;  %v1466_v47 = vor.u32 %v1715_v45, %v1465_v44  ;;  %v1477_v50 = vld [vmem:[%s2011_s21 + $0x20] sm:$0xf]  ;;  %v1718_v51 = vld [vmem:[%s2011_s21 + $0x28] sm:$0xf0]  ;;  %v1474_v52 = vor.u32 %v1716_v48, %v1471_v49  ;;  %v1719_v54 = vld [vmem:[%s2011_s21 + $0x34] sm:$0xf] }
  0x1a   : > { %v1478_v53 = vor.u32 %v1718_v51, %v1477_v50  ;;  %v1483_v55 = vld [vmem:[%s2011_s21 + $0x3c] sm:$0xf0]  ;;  %v1489_v56 = vld [vmem:[%s2011_s21 + $0x38] sm:$0xf]  ;;  %v1721_v57 = vld [vmem:[%s2011_s21 + $0x40] sm:$0xf0] }
  0x1b   : > { %v1486_v58 = vor.u32 %v1719_v54, %v1483_v55  ;;  %v1490_v59 = vor.u32 %v1721_v57, %v1489_v56  ;;  %v1722_v60 = vld [vmem:[%s2011_s21 + $0x4c] sm:$0xf]  ;;  %v1495_v61 = vld [vmem:[%s2011_s21 + $0x54] sm:$0xf0]  ;;  %v1501_v62 = vld [vmem:[%s2011_s21 + $0x50] sm:$0xf] }
  0x1c   : > { %1836 = vmatpush.bf16.msra.mxu1 %v1740_v4  ;;  %1837 = vmatpush.bf16.msra.mxu2 %v1740_v4  ;;  %v1724_v63 = vld [vmem:[%s2011_s21 + $0x58] sm:$0xf0]  ;;  %v1498_v0 = vor.u32 %v1722_v60, %v1495_v61  ;;  %v1529_v2 = vld [vmem:[%s2011_s21 + $0x90] sm:$0xf]  ;;  %v1727_v8 = vld [vmem:[%s2011_s21 + $0x70] sm:$0xf0] }
  0x1d   : > { %663 = vmatpush.bf16.msra.mxu0 %v1740_v4  ;;  %1838 = vmatpush.bf16.msra.mxu3 %v1740_v4  ;;  %v1502_v1 = vor.u32 %v1724_v63, %v1501_v62  ;;  %v1732_v3 = vld [vmem:[%s2011_s21 + $0x98] sm:$0xf0]  ;;  %v1541_v11 = vld [vmem:[%s2011_s21 + $0xa8] sm:$0xf]  ;;  %v1525_v16 = vld [vmem:[%s2011_s21 + $0x80] sm:$0xf] }
  0x1e   : > { %v1530_v4 = vor.u32 %v1732_v3, %v1529_v2  ;;  %v1730_v17 = vld [vmem:[%s2011_s21 + $0x88] sm:$0xf0]  ;;  %v1731_v25 = vld [vmem:[%s2011_s21 + $0x94] sm:$0xf]  ;;  %v1531_v26 = vld [vmem:[%s2011_s21 + $0x9c] sm:$0xf0] }
  0x1f   : > { %v1537_v27 = vld [vmem:[%s2011_s21 + $0x98] sm:$0xf]  ;;  %v1733_v28 = vld [vmem:[%s2011_s21 + $0xa0] sm:$0xf0]  ;;  %v928_v34 = vld [vmem:[%s2111_s20 + $0x8] sm:$0xff] }
  0x20   : > { %1839 = vmatpush.bf16.msra.mxu1 %v1739_v5  ;;  %1840 = vmatpush.bf16.msra.mxu2 %v1739_v5  ;;  %v1764_v33 = vld [vmem:[%s2355_s3 + $0x18] sm:$0xff]  ;;  %v1549_v42 = vld [vmem:[%s2011_s21 + $0xb0] sm:$0xf]  ;;  %v1761_v45 = vld [vmem:[%s2355_s3] sm:$0xff] }
  0x21   : > { %664 = vmatpush.bf16.msra.mxu0 %v1739_v5  ;;  %1841 = vmatpush.bf16.msra.mxu3 %v1739_v5  ;;  %v1725_v5 = vld [vmem:[%s2011_s21 + $0x64] sm:$0xf]  ;;  %v1736_v43 = vld [vmem:[%s2011_s21 + $0xb8] sm:$0xf0]  ;;  %v929_v49 = vld [vmem:[%s2111_s20 + $0x10] sm:$0xff] }
  0x22   : > { %v936_v50 = vld [vmem:[%s2111_s20 + $0x48] sm:$0xff]  ;;  %v939_v54 = vld [vmem:[%s2111_s20 + $0x60] sm:$0xff]  ;;  %v937_v63 = vld [vmem:[%s2111_s20 + $0x50] sm:$0xff] }
  0x24   : > { %1842 = vmatpush.bf16.msra.mxu1 %v1738_v6  ;;  %1843 = vmatpush.bf16.msra.mxu2 %v1738_v6 }
  0x25   : > { %665 = vmatpush.bf16.msra.mxu0 %v1738_v6  ;;  %1844 = vmatpush.bf16.msra.mxu3 %v1738_v6  ;;  %v1507_v6 = vld [vmem:[%s2011_s21 + $0x6c] sm:$0xf0] }
  0x26   : > { %v1510_v9 = vor.u32 %v1725_v5, %v1507_v6 }
  0x28   : > { %1845 = vmatpush.bf16.msra.mxu1 %v1737_v7  ;;  %1846 = vmatpush.bf16.msra.mxu2 %v1737_v7 }
  0x29   : > { %666 = vmatpush.bf16.msra.mxu0 %v1737_v7  ;;  %1847 = vmatpush.bf16.msra.mxu3 %v1737_v7  ;;  %v1513_v7 = vld [vmem:[%s2011_s21 + $0x68] sm:$0xf] }
  0x2a   : > { %v1514_v10 = vor.u32 %v1727_v8, %v1513_v7  ;;  %v940_v8 = vld [vmem:[%s2111_s20 + $0x68] sm:$0xff] }
  0x2b   : > { %677 = vmatmul.bf16.vlgmr.msra.gmra.mxu1 %v1482_v14  ;;  %687 = vmatmul.bf16.vlgmr.msra.gmra.mxu2 %v1506_v15  ;;  %v1728_v14 = vld [vmem:[%s2011_s21 + $0x7c] sm:$0xf]  ;;  %v1519_v15 = vld [vmem:[%s2011_s21 + $0x84] sm:$0xf0] }
  0x2c   : > { %757 = vmatpush.bf16.msrb.mxu2 %v1760_v12  ;;  %708 = vmatpush.bf16.msrb.mxu1 %v1752_v13  ;;  %v1735_v12 = vld [vmem:[%s2011_s21 + $0xb0] sm:$0xf0] }
  0x2d   : > { %667 = vmatmul.bf16.vlgmr.msra.gmra.mxu0 %v1458_v20  ;;  %697 = vmatmul.bf16.vlgmr.msra.gmra.mxu3 %v1530_v4  ;;  %v1542_v13 = vor.u32 %v1735_v12, %v1541_v11  ;;  %v1768_v20 = vld [vmem:[%s2355_s3 + $0x38] sm:$0xff]  ;;  %v931_v11 = vld [vmem:[%s2111_s20 + $0x20] sm:$0xff] }
  0x2e   : > { %878 = vmatpush.bf16.msrb.mxu3 %v1768_v20  ;;  %v932_v20 = vld [vmem:[%s2111_s20 + $0x28] sm:$0xff] }
  0x30   : > { %758 = vmatpush.bf16.msrb.mxu2 %v1759_v18  ;;  %709 = vmatpush.bf16.msrb.mxu1 %v1751_v19  ;;  %v1522_v18 = vor.u32 %v1728_v14, %v1519_v15  ;;  %v1526_v19 = vor.u32 %v1730_v17, %v1525_v16 }
  0x34   : > { %759 = vmatpush.bf16.msrb.mxu2 %v1758_v21  ;;  %710 = vmatpush.bf16.msrb.mxu1 %v1750_v22  ;;  %v1767_v21 = vld [vmem:[%s2355_s3 + $0x30] sm:$0xff]  ;;  %v1766_v22 = vld [vmem:[%s2355_s3 + $0x28] sm:$0xff] }
  0x35   : > { %879 = vmatpush.bf16.msrb.mxu3 %v1767_v21 }
  0x38   : > { %760 = vmatpush.bf16.msrb.mxu2 %v1757_v23  ;;  %711 = vmatpush.bf16.msrb.mxu1 %v1749_v24  ;;  %v927_v23 = vld [vmem:[%s2111_s20] sm:$0xff]  ;;  %v1935_v24 = vmov 0  }
  0x39   : > { %1858 = vset.pattern.permute.xlu0 %v1935_v24  ;;  %1859 = vset.pattern.permute.xlu1 %v1935_v24 }
  0x3a   : > { %945 = vperm.xlu0 %1858, %v927_v23   ;;  %1860 = vset.pattern.permute.xlu2 %v1935_v24  ;;  %v935_v23 = vld [vmem:[%s2111_s20 + $0x40] sm:$0xff] }
  0x3b   : > { %682 = vmatmul.bf16.gmra.mxu1 %v1494_v31  ;;  %692 = vmatmul.bf16.gmra.mxu2 %v1518_v32  ;;  %v1538_v31 = vor.u32 %v1733_v28, %v1537_v27 }
  0x3c   : > { %761 = vmatpush.bf16.msrb.mxu2 %v1756_v29  ;;  %712 = vmatpush.bf16.msrb.mxu1 %v1748_v30  ;;  %v1765_v29 = vld [vmem:[%s2355_s3 + $0x20] sm:$0xff]  ;;  %v1534_v30 = vor.u32 %v1731_v25, %v1531_v26 }
  0x3d   : > { %672 = vmatmul.bf16.gmra.mxu0 %v1470_v37  ;;  %702 = vmatmul.bf16.gmra.mxu3 %v1542_v13 }
  0x3e   : > { %880 = vmatpush.bf16.msrb.mxu3 %v1766_v22  ;;  %955 = vperm.xlu1 %1859, %v929_v49  }
  0x3f   : > { %965 = vperm.xlu2 %1860, %v931_v11  }
  0x40   : > { %762 = vmatpush.bf16.msrb.mxu2 %v1755_v35  ;;  %713 = vmatpush.bf16.msrb.mxu1 %v1747_v36  ;;  %v1763_v36 = vld [vmem:[%s2355_s3 + $0x10] sm:$0xff] }
  0x42   : > { %881 = vmatpush.bf16.msrb.mxu3 %v1765_v29  ;;  %950 = vperm.xlu0 %1858, %v928_v34  }
  0x44   : > { %763 = vmatpush.bf16.msrb.mxu2 %v1754_v38  ;;  %714 = vmatpush.bf16.msrb.mxu1 %v1746_v39  ;;  %v1762_v38 = vld [vmem:[%s2355_s3 + $0x8] sm:$0xff]  ;;  %v933_v39 = vld [vmem:[%s2111_s20 + $0x30] sm:$0xff] }
  0x46   : > { %882 = vmatpush.bf16.msrb.mxu3 %v1764_v33 }
  0x47   : > { %970 = vperm.xlu2 %1860, %v932_v20   ;;  %v1770_v20 = vld [vmem:[%s2357_s5 + $0x8] sm:$0xff] }
  0x48   : > { %764 = vmatpush.bf16.msrb.mxu2 %v1753_v40  ;;  %715 = vmatpush.bf16.msrb.mxu1 %v1745_v41  ;;  %v1734_v40 = vld [vmem:[%s2011_s21 + $0xac] sm:$0xf]  ;;  %v1543_v41 = vld [vmem:[%s2011_s21 + $0xb4] sm:$0xf0] }
  0x4a   : > { %883 = vmatpush.bf16.msrb.mxu3 %v1763_v36  ;;  %975 = vperm.xlu0 %1858, %v933_v39   ;;  %v941_v36 = vld [vmem:[%s2111_s20 + $0x70] sm:$0xff] }
  0x4b   : > { %716 = vmatmul.bf16.vlgmr.msrb.gmra.mxu1 %v1462_v46  ;;  %765 = vmatmul.bf16.vlgmr.msrb.gmra.mxu2 %v1466_v47  ;;  %v1546_v46 = vor.u32 %v1734_v40, %v1543_v41  ;;  %v1550_v47 = vor.u32 %v1736_v43, %v1549_v42 }
  0x4e   : > { %884 = vmatpush.bf16.msrb.mxu3 %v1762_v38 }
  0x4f   : > { %985 = vperm.xlu2 %1860, %v935_v23  }
  0x52   : > { %885 = vmatpush.bf16.msrb.mxu3 %v1761_v45  ;;  %990 = vperm.xlu0 %1858, %v936_v50  }
  0x5a   : > { %1005 = vperm.xlu0 %1858, %v939_v54  }
  0x5b   : > { %721 = vmatmul.bf16.gmra.mxu1 %v1474_v52  ;;  %770 = vmatmul.bf16.gmra.mxu2 %v1478_v53  ;;  %v930_v53 = vld [vmem:[%s2111_s20 + $0x18] sm:$0xff] }
  0x5c   : > { %960 = vperm.xlu1 %1859, %v930_v53  }
  0x6b   : > { %726 = vmatmul.bf16.gmra.mxu1 %v1486_v58  ;;  %775 = vmatmul.bf16.gmra.mxu2 %v1490_v59  ;;  %v934_v58 = vld [vmem:[%s2111_s20 + $0x38] sm:$0xff] }
  0x6c   : > { %v942_v59 = vld [vmem:[%s2111_s20 + $0x78] sm:$0xff]  ;;  %980 = vperm.xlu1 %1859, %v934_v58  }
  0x6d   : > { %1020 = vperm.xlu0 %1858, %v942_v59  }
  0x74   : > { %995 = vperm.xlu1 %1859, %v937_v63  }
  0x7b   : > { %731 = vmatmul.bf16.gmra.mxu1 %v1498_v0  ;;  %780 = vmatmul.bf16.gmra.mxu2 %v1502_v1 }
  0x7c   : > { %1010 = vperm.xlu1 %1859, %v940_v8  }
  0x8b   : > { %736 = vmatmul.bf16.gmra.mxu1 %v1510_v9  ;;  %785 = vmatmul.bf16.gmra.mxu2 %v1514_v10 }
  0x9b   : > { %741 = vmatmul.bf16.gmra.mxu1 %v1522_v18  ;;  %790 = vmatmul.bf16.gmra.mxu2 %v1526_v19 }
  0xa8   : > { %v2127_v32 = vpop.f32.mrf.mxu1 }
  0xaa   : > { %v668_v55 = vpop.f32.mrf.mxu0 }
  0xab   : > { %746 = vmatmul.bf16.gmra.mxu1 %v1534_v30  ;;  %795 = vmatmul.bf16.gmra.mxu2 %v1538_v31  ;;  %v938_v31 = vld [vmem:[%s2111_s20 + $0x58] sm:$0xff] }
  0xac   : > { %1000 = vperm.xlu2 %1860, %v938_v31  }
  0xae   : > { %v2133_v35 = vpop.f32.mrf.mxu2 }
  0xb0   : > { %v2138_v37 = vpop.f32.mrf.mxu1  ;;  %v698_v59 = vpop.f32.mrf.mxu3 }
  0xb2   : > { %v670_v61 = vpop.f32.mrf.mxu0 }
  0xb4   : > { %1015 = vperm.xlu2 %1860, %v941_v36  }
  0xb6   : > { %v2148_v44 = vpop.f32.mrf.mxu2 }
  0xb8   : > { %v2153_v48 = vpop.f32.mrf.mxu1 }
  0xba   : > { %v673_v7 = vpop.f32.mrf.mxu0 }
  0xbb   : > { %751 = vmatmul.bf16.gmra.mxu1 %v1546_v46  ;;  %800 = vmatmul.bf16.gmra.mxu2 %v1550_v47 }
  0xbe   : > { %v2157_v51 = vpop.f32.mrf.mxu2 }
  0xc0   : > { %v685_v52 = vpop.f32.mrf.mxu1 }
  0xc2   : > { %v675_v13 = vpop.f32.mrf.mxu0 }
  0xc6   : > { %v2161_v56 = vpop.f32.mrf.mxu2 }
  0xc8   : > { %v717_v57 = vpop.f32.mrf.mxu1 }
  0xc9   : > { %v718_v0 = vadd.f32 %v717_v57, %v668_v55 }
  0xce   : > { %v766_v60 = vpop.f32.mrf.mxu2 }
  0xcf   : > { %v767_v3 = vadd.f32 %v766_v60, %v718_v0  ;;  %v1775_v0 = vld [vmem:[%s2357_s5 + $0x30] sm:$0xff] }
  0xd0   : > { %v719_v62 = vpop.f32.mrf.mxu1 }
  0xd1   : > { %v720_v1 = vadd.f32 %v719_v62, %v670_v61 }
  0xd6   : > { %v768_v2 = vpop.f32.mrf.mxu2 }
  0xd7   : > { %v769_v4 = vadd.f32 %v768_v2, %v720_v1 }
  0xd8   : > { %v722_v5 = vpop.f32.mrf.mxu1 }
  0xd9   : > { %v806_v6 = vpack.c.bf16 %v769_v4, %v767_v3  ;;  %v723_v12 = vadd.f32 %v722_v5, %v673_v7  ;;  %v1773_v5 = vld [vmem:[%s2357_s5 + $0x20] sm:$0xff] }
  0xdb   : > { %886 = vmatmul.bf16.vlgmr.msrb.gmra.mxu3 %v806_v6 }
  0xde   : > { %v771_v9 = vpop.f32.mrf.mxu2 }
  0xdf   : > { %v772_v16 = vadd.f32 %v771_v9, %v723_v12 }
  0xe0   : > { %v724_v10 = vpop.f32.mrf.mxu1 }
  0xe1   : > { %v725_v14 = vadd.f32 %v724_v10, %v675_v13  ;;  %v1772_v13 = vld [vmem:[%s2357_s5 + $0x18] sm:$0xff] }
  0xe6   : > { %v773_v15 = vpop.f32.mrf.mxu2 }
  0xe7   : > { %v774_v17 = vadd.f32 %v773_v15, %v725_v14  ;;  %v1771_v15 = vld [vmem:[%s2357_s5 + $0x10] sm:$0xff] }
  0xe8   : > { %v727_v18 = vpop.f32.mrf.mxu1 }
  0xe9   : > { %v807_v19 = vpack.c.bf16 %v774_v17, %v772_v16  ;;  %v728_v24 = vadd.f32 %v727_v18, %v2127_v32 }
  0xeb   : > { %891 = vmatmul.bf16.gmra.mxu3 %v807_v19 }
  0xee   : > { %v776_v21 = vpop.f32.mrf.mxu2 }
  0xef   : > { %v777_v27 = vadd.f32 %v776_v21, %v728_v24  ;;  %v1769_v24 = vld [vmem:[%s2357_s5] sm:$0xff] }
  0xf0   : > { %v729_v22 = vpop.f32.mrf.mxu1 }
  0xf1   : > { %v730_v25 = vadd.f32 %v729_v22, %v2138_v37 }
  0xf6   : > { %v778_v26 = vpop.f32.mrf.mxu2 }
  0xf7   : > { %v779_v28 = vadd.f32 %v778_v26, %v730_v25  ;;  %v946_v25 = vpop.permute.xlu0 %945 }
  0xf8   : > { %v732_v29 = vpop.f32.mrf.mxu1 }
  0xf9   : > { %v808_v30 = vpack.c.bf16 %v779_v28, %v777_v27  ;;  %v733_v38 = vadd.f32 %v732_v29, %v2153_v48  ;;  %v2206_v28 = vld [vmem:[%s2356_s4] ss:$0 sm:$0xff] }
  0xfb   : > { %896 = vmatmul.bf16.gmra.mxu3 %v808_v30 }
  0xfe   : > { %v781_v33 = vpop.f32.mrf.mxu2 }
  0xff   : > { %v782_v41 = vadd.f32 %v781_v33, %v733_v38  ;;  %v951_v29 = vpop.permute.xlu0 %950 }
 0x100   : > { %v734_v34 = vpop.f32.mrf.mxu1 }
 0x101   : > { %v735_v39 = vadd.f32 %v734_v34, %v685_v52 }
 0x106   : > { %v783_v40 = vpop.f32.mrf.mxu2 }
 0x107   : > { %v784_v32 = vadd.f32 %v783_v40, %v735_v39  ;;  %v956_v39 = vpop.permute.xlu1 %955 }
 0x108   : > { %v737_v42 = vpop.f32.mrf.mxu1 }
 0x109   : > { %v809_v37 = vpack.c.bf16 %v784_v32, %v782_v41  ;;  %v738_v46 = vadd.f32 %v737_v42, %v2133_v35 }
 0x10b   : > { %901 = vmatmul.bf16.gmra.mxu3 %v809_v37 }
 0x10e   : > { %v786_v43 = vpop.f32.mrf.mxu2 }
 0x10f   : > { %v787_v50 = vadd.f32 %v786_v43, %v738_v46  ;;  %v961_v42 = vpop.permute.xlu1 %960 }
 0x110   : > { %v739_v45 = vpop.f32.mrf.mxu1 }
 0x111   : > { %v740_v47 = vadd.f32 %v739_v45, %v2148_v44  ;;  %v1776_v44 = vld [vmem:[%s2357_s5 + $0x38] sm:$0xff] }
 0x112   : > { %1151 = vmatpush.bf16.msrb.mxu0 %v1776_v44 }
 0x116   : > { %v788_v49 = vpop.f32.mrf.mxu2  ;;  %1152 = vmatpush.bf16.msrb.mxu0 %v1775_v0 }
 0x117   : > { %v789_v53 = vadd.f32 %v788_v49, %v740_v47  ;;  %v981_v0 = vpop.permute.xlu1 %980 }
 0x118   : > { %v742_v54 = vpop.f32.mrf.mxu1 }
 0x119   : > { %v810_v55 = vpack.c.bf16 %v789_v53, %v787_v50  ;;  %v743_v57 = vadd.f32 %v742_v54, %v2157_v51  ;;  %v700_v51 = vpop.f32.mrf.mxu3  ;;  %v966_v50 = vpop.permute.xlu2 %965 }
 0x11b   : > { %906 = vmatmul.bf16.gmra.mxu3 %v810_v55 }
 0x11e   : > { %v791_v48 = vpop.f32.mrf.mxu2 }
 0x11f   : > { %v792_v61 = vadd.f32 %v791_v48, %v743_v57 }
 0x120   : > { %v744_v52 = vpop.f32.mrf.mxu1 }
 0x121   : > { %v745_v58 = vadd.f32 %v744_v52, %v2161_v56  ;;  %v1774_v56 = vld [vmem:[%s2357_s5 + $0x28] sm:$0xff]  ;;  %v703_v11 = vpop.f32.mrf.mxu3  ;;  %v971_v48 = vpop.permute.xlu2 %970 }
 0x122   : > { %1153 = vmatpush.bf16.msrb.mxu0 %v1774_v56 }
 0x126   : > { %v793_v60 = vpop.f32.mrf.mxu2  ;;  %1154 = vmatpush.bf16.msrb.mxu0 %v1773_v5 }
 0x127   : > { %v794_v62 = vadd.f32 %v793_v60, %v745_v58 }
 0x128   : > { %v747_v63 = vpop.f32.mrf.mxu1 }
 0x129   : > { %v811_v35 = vpack.c.bf16 %v794_v62, %v792_v61  ;;  %v748_v3 = vadd.f32 %v747_v63, %v698_v59  ;;  %v705_v17 = vpop.f32.mrf.mxu3 }
 0x12a   : > { %1155 = vmatpush.bf16.msrb.mxu0 %v1772_v13 }
 0x12b   : > { %911 = vmatmul.bf16.gmra.mxu3 %v811_v35  ;;  %v976_v35 = vpop.permute.xlu0 %975 }
 0x12e   : > { %v796_v1 = vpop.f32.mrf.mxu2  ;;  %1156 = vmatpush.bf16.msrb.mxu0 %v1771_v15 }
 0x12f   : > { %v797_v7 = vadd.f32 %v796_v1, %v748_v3 }
 0x130   : > { %v749_v2 = vpop.f32.mrf.mxu1 }
 0x131   : > { %v750_v4 = vadd.f32 %v749_v2, %v700_v51 }
 0x132   : > { %1157 = vmatpush.bf16.msrb.mxu0 %v1770_v20 }
 0x136   : > { %v798_v6 = vpop.f32.mrf.mxu2  ;;  %1158 = vmatpush.bf16.msrb.mxu0 %v1769_v24 }
 0x137   : > { %v799_v8 = vadd.f32 %v798_v6, %v750_v4 }
 0x138   : > { %v752_v9 = vpop.f32.mrf.mxu1 }
 0x139   : > { %v812_v10 = vpack.c.bf16 %v799_v8, %v797_v7  ;;  %v753_v16 = vadd.f32 %v752_v9, %v703_v11  ;;  %v986_v7 = vpop.permute.xlu2 %985  ;;  %v991_v9 = vpop.permute.xlu0 %990 }
 0x13b   : > { %916 = vmatmul.bf16.gmra.mxu3 %v812_v10 }
 0x13e   : > { %v801_v12 = vpop.f32.mrf.mxu2 }
 0x13f   : > { %v802_v21 = vadd.f32 %v801_v12, %v753_v16 }
 0x140   : > { %v754_v14 = vpop.f32.mrf.mxu1 }
 0x141   : > { %v755_v18 = vadd.f32 %v754_v14, %v705_v17  ;;  %v1001_v20 = vpop.permute.xlu2 %1000 }
 0x146   : > { %v803_v19 = vpop.f32.mrf.mxu2 }
 0x147   : > { %v804_v22 = vadd.f32 %v803_v19, %v755_v18  ;;  %v996_v18 = vpop.permute.xlu1 %995 }
 0x149   : > { %v813_v23 = vpack.c.bf16 %v804_v22, %v802_v21 }
 0x14b   : > { %921 = vmatmul.bf16.gmra.mxu3 %v813_v23 }
 0x15e   : > { %v887_v26 = vpop.f32.mrf.mxu3 }
 0x15f   : > { %v1023_v27 = vmul.f32 %v946_v25, %v887_v26 }
 0x161   : > { %v1043_v31 = vadd.f32 %v2206_v28, %v1023_v27 }
 0x163   : > { %v1059_v36 = vmax.f32 %v1043_v31, 0.0 }
 0x166   : > { %v889_v30 = vpop.f32.mrf.mxu3 }
 0x167   : > { %v1024_v33 = vmul.f32 %v951_v29, %v889_v30  ;;  %v1006_v30 = vpop.permute.xlu0 %1005 }
 0x169   : > { %v1044_v34 = vadd.f32 %v2206_v28, %v1024_v33  ;;  %v1011_v33 = vpop.permute.xlu1 %1010 }
 0x16b   : > { %v1060_v38 = vmax.f32 %v1044_v34, 0.0 }
 0x16d   : > { %v1075_v40 = vpack.c.bf16 %v1060_v38, %v1059_v36 }
 0x16e   : > { %v892_v41 = vpop.f32.mrf.mxu3 }
 0x16f   : > { %1159 = vmatmul.bf16.vlgmr.msrb.gmra.mxu0 %v1075_v40  ;;  %v1025_v32 = vmul.f32 %v956_v39, %v892_v41 }
 0x171   : > { %v1045_v43 = vadd.f32 %v2206_v28, %v1025_v32 }
 0x173   : > { %v1061_v47 = vmax.f32 %v1045_v43, 0.0 }
 0x176   : > { %v894_v37 = vpop.f32.mrf.mxu3 }
 0x177   : > { %v1026_v45 = vmul.f32 %v961_v42, %v894_v37  ;;  %v1016_v37 = vpop.permute.xlu2 %1015 }
 0x179   : > { %v1046_v46 = vadd.f32 %v2206_v28, %v1026_v45  ;;  %v1021_v45 = vpop.permute.xlu0 %1020 }
 0x17b   : > { %v1062_v49 = vmax.f32 %v1046_v46, 0.0 }
 0x17d   : > { %v1076_v53 = vpack.c.bf16 %v1062_v49, %v1061_v47 }
 0x17e   : > { %v897_v54 = vpop.f32.mrf.mxu3 }
 0x17f   : > { %1164 = vmatmul.bf16.gmra.mxu0 %v1076_v53  ;;  %v1027_v55 = vmul.f32 %v966_v50, %v897_v54 }
 0x181   : > { %v1047_v57 = vadd.f32 %v2206_v28, %v1027_v55 }
 0x183   : > { %v1063_v60 = vmax.f32 %v1047_v57, 0.0 }
 0x186   : > { %v899_v52 = vpop.f32.mrf.mxu3 }
 0x187   : > { %v1028_v58 = vmul.f32 %v971_v48, %v899_v52  ;;  %v1862_v48 = vld [vmem:[%s2358_s6] ss:$0 sm:$0xff] }
 0x189   : > { %v1048_v59 = vadd.f32 %v2206_v28, %v1028_v58 }
 0x18b   : > { %v1064_v61 = vmax.f32 %v1048_v59, 0.0 }
 0x18d   : > { %v1077_v62 = vpack.c.bf16 %v1064_v61, %v1063_v60 }
 0x18e   : > { %v902_v63 = vpop.f32.mrf.mxu3 }
 0x18f   : > { %1169 = vmatmul.bf16.gmra.mxu0 %v1077_v62  ;;  %v1029_v44 = vmul.f32 %v976_v35, %v902_v63 }
 0x191   : > { %v1049_v51 = vadd.f32 %v2206_v28, %v1029_v44 }
 0x193   : > { %v1065_v3 = vmax.f32 %v1049_v51, 0.0 }
 0x196   : > { %v904_v1 = vpop.f32.mrf.mxu3 }
 0x197   : > { %v1030_v2 = vmul.f32 %v981_v0, %v904_v1 }
 0x199   : > { %v1050_v56 = vadd.f32 %v2206_v28, %v1030_v2 }
 0x19b   : > { %v1066_v4 = vmax.f32 %v1050_v56, 0.0 }
 0x19d   : > { %v1078_v5 = vpack.c.bf16 %v1066_v4, %v1065_v3 }
 0x19e   : > { %v907_v6 = vpop.f32.mrf.mxu3 }
 0x19f   : > { %1174 = vmatmul.bf16.gmra.mxu0 %v1078_v5  ;;  %v1031_v8 = vmul.f32 %v986_v7, %v907_v6 }
 0x1a1   : > { %v1051_v11 = vadd.f32 %v2206_v28, %v1031_v8 }
 0x1a3   : > { %v1067_v14 = vmax.f32 %v1051_v11, 0.0 }
 0x1a6   : > { %v909_v10 = vpop.f32.mrf.mxu3 }
 0x1a7   : > { %v1032_v12 = vmul.f32 %v991_v9, %v909_v10 }
 0x1a9   : > { %v1052_v13 = vadd.f32 %v2206_v28, %v1032_v12 }
 0x1ab   : > { %v1068_v15 = vmax.f32 %v1052_v13, 0.0 }
 0x1ad   : > { %v1079_v16 = vpack.c.bf16 %v1068_v15, %v1067_v14 }
 0x1ae   : > { %v912_v17 = vpop.f32.mrf.mxu3 }
 0x1af   : > { %1179 = vmatmul.bf16.gmra.mxu0 %v1079_v16  ;;  %v1033_v19 = vmul.f32 %v996_v18, %v912_v17 }
 0x1b1   : > { %v1053_v22 = vadd.f32 %v2206_v28, %v1033_v19 }
 0x1b3   : > { %v1069_v25 = vmax.f32 %v1053_v22, 0.0 }
 0x1b6   : > { %v914_v21 = vpop.f32.mrf.mxu3 }
 0x1b7   : > { %v1034_v23 = vmul.f32 %v1001_v20, %v914_v21 }
 0x1b9   : > { %v1054_v24 = vadd.f32 %v2206_v28, %v1034_v23 }
 0x1bb   : > { %v1070_v26 = vmax.f32 %v1054_v24, 0.0 }
 0x1bd   : > { %v1080_v27 = vpack.c.bf16 %v1070_v26, %v1069_v25 }
 0x1be   : > { %v917_v29 = vpop.f32.mrf.mxu3 }
 0x1bf   : > { %1184 = vmatmul.bf16.gmra.mxu0 %v1080_v27  ;;  %v1035_v31 = vmul.f32 %v1006_v30, %v917_v29 }
 0x1c1   : > { %v1055_v36 = vadd.f32 %v2206_v28, %v1035_v31 }
 0x1c3   : > { %v1071_v40 = vmax.f32 %v1055_v36, 0.0 }
 0x1c6   : > { %v919_v34 = vpop.f32.mrf.mxu3 }
 0x1c7   : > { %v1036_v38 = vmul.f32 %v1011_v33, %v919_v34 }
 0x1c9   : > { %v1056_v39 = vadd.f32 %v2206_v28, %v1036_v38 }
 0x1cb   : > { %v1072_v41 = vmax.f32 %v1056_v39, 0.0 }
 0x1cd   : > { %v1081_v32 = vpack.c.bf16 %v1072_v41, %v1071_v40 }
 0x1ce   : > { %v922_v42 = vpop.f32.mrf.mxu3 }
 0x1cf   : > { %1189 = vmatmul.bf16.gmra.mxu0 %v1081_v32  ;;  %v1037_v43 = vmul.f32 %v1016_v37, %v922_v42 }
 0x1d1   : > { %v1057_v47 = vadd.f32 %v2206_v28, %v1037_v43 }
 0x1d3   : > { %v1073_v53 = vmax.f32 %v1057_v47, 0.0 }
 0x1d6   : > { %v924_v46 = vpop.f32.mrf.mxu3 }
 0x1d7   : > { %v1038_v49 = vmul.f32 %v1021_v45, %v924_v46 }
 0x1d9   : > { %v1058_v50 = vadd.f32 %v2206_v28, %v1038_v49 }
 0x1db   : > { %v1074_v54 = vmax.f32 %v1058_v50, 0.0 }
 0x1dd   : > { %v1082_v55 = vpack.c.bf16 %v1074_v54, %v1073_v53 }
 0x1df   : > { %1194 = vmatmul.bf16.gmra.mxu0 %v1082_v55 }
 0x1ec   : > { %v1160_v52 = vpop.f32.mrf.mxu0 }
 0x1ed   : > { %v1161_v57 = vadd.f32 %v1862_v48, %v1160_v52 }
 0x1ef   : > { %1200 = vmax.xlane.f32.xlu1 %v1161_v57 }
 0x1f4   : > { %v1162_v58 = vpop.f32.mrf.mxu0 }
 0x1f5   : > { %v1163_v59 = vadd.f32 %v1862_v48, %v1162_v58 }
 0x1f7   : > { %1202 = vmax.xlane.f32.xlu2 %v1163_v59 }
 0x1fc   : > { %v1165_v60 = vpop.f32.mrf.mxu0 }
 0x1fd   : > { %v1166_v61 = vadd.f32 %v1862_v48, %v1165_v60 }
 0x1ff   : > { %1204 = vmax.xlane.f32.xlu0 %v1166_v61 }
 0x204   : > { %v1167_v62 = vpop.f32.mrf.mxu0 }
 0x205   : > { %v1168_v63 = vadd.f32 %v1862_v48, %v1167_v62 }
 0x207   : > { %1206 = vmax.xlane.f32.xlu2 %v1168_v63 }
 0x20c   : > { %v1170_v28 = vpop.f32.mrf.mxu0 }
 0x20d   : > { %v1171_v35 = vadd.f32 %v1862_v48, %v1170_v28 }
 0x20f   : > { %1208 = vmax.xlane.f32.xlu1 %v1171_v35 }
 0x214   : > { %v1172_v44 = vpop.f32.mrf.mxu0 }
 0x215   : > { %v2227_v0 = vadd.f32 %v1862_v48, %v1172_v44 }
 0x217   : > { %1210 = vmax.xlane.f32.xlu2 %v2227_v0 }
 0x21c   : > { %v1175_v1 = vpop.f32.mrf.mxu0 }
 0x21d   : > { %v2230_v51 = vadd.f32 %v1862_v48, %v1175_v1 }
 0x21f   : > { %1212 = vmax.xlane.f32.xlu0 %v2230_v51 }
 0x224   : > { %v1177_v2 = vpop.f32.mrf.mxu0 }
 0x225   : > { %v2233_v56 = vadd.f32 %v1862_v48, %v1177_v2 }
 0x227   : > { %1214 = vmax.xlane.f32.xlu1 %v2233_v56 }
 0x22c   : > { %v1180_v3 = vpop.f32.mrf.mxu0 }
 0x22d   : > { %v2236_v4 = vadd.f32 %v1862_v48, %v1180_v3 }
 0x22f   : > { %1216 = vmax.xlane.f32.xlu2 %v2236_v4 }
 0x234   : > { %v1182_v5 = vpop.f32.mrf.mxu0 }
 0x235   : > { %v2239_v6 = vadd.f32 %v1862_v48, %v1182_v5 }
 0x237   : > { %1218 = vmax.xlane.f32.xlu0 %v2239_v6 }
 0x23c   : > { %v1185_v7 = vpop.f32.mrf.mxu0 }
 0x23d   : > { %v2242_v8 = vadd.f32 %v1862_v48, %v1185_v7 }
 0x23f   : > { %1220 = vmax.xlane.f32.xlu1 %v2242_v8 }
 0x244   : > { %v1187_v9 = vpop.f32.mrf.mxu0 }
 0x245   : > { %v2245_v10 = vadd.f32 %v1862_v48, %v1187_v9 }
 0x247   : > { %1222 = vmax.xlane.f32.xlu2 %v2245_v10 }
 0x24c   : > { %v1190_v11 = vpop.f32.mrf.mxu0 }
 0x24d   : > { %v2248_v12 = vadd.f32 %v1862_v48, %v1190_v11 }
 0x24f   : > { %1224 = vmax.xlane.f32.xlu0 %v2248_v12 }
 0x254   : > { %v1192_v13 = vpop.f32.mrf.mxu0 }
 0x255   : > { %v2251_v14 = vadd.f32 %v1862_v48, %v1192_v13 }
 0x257   : > { %1226 = vmax.xlane.f32.xlu1 %v2251_v14 }
 0x25c   : > { %v1195_v15 = vpop.f32.mrf.mxu0 }
 0x25d   : > { %v2254_v16 = vadd.f32 %v1862_v48, %v1195_v15 }
 0x25f   : > { %1228 = vmax.xlane.f32.xlu2 %v2254_v16 }
 0x262   : > { %v1201_v17 = vpop.xlane.xlu1 %1200 }
 0x263   : > { %v1232_v18 = vsub.f32 %v1161_v57, %v1201_v17 }
 0x264   : > { %v1197_v19 = vpop.f32.mrf.mxu0 }
 0x265   : > { %v1248_v20 = vmul.f32 1.442695, %v1232_v18  ;;  %v2257_v21 = vadd.f32 %v1862_v48, %v1197_v19 }
 0x267   : > { %1863 = vpow2.f32 %v1248_v20  ;;  %1230 = vmax.xlane.f32.xlu0 %v2257_v21 }
 0x26a   : > { %v1203_v22 = vpop.xlane.xlu2 %1202 }
 0x26b   : > { %v1233_v23 = vsub.f32 %v1163_v59, %v1203_v22 }
 0x26d   : > { %v2260_v24 = vpop.eup %1863  ;;  %v1250_v25 = vmul.f32 1.442695, %v1233_v23 }
 0x26e   : > { %1280 = vadd.xlane.f32.xlu1 %v2260_v24 }
 0x26f   : > { %1865 = vpow2.f32 %v1250_v25 }
 0x272   : > { %v1205_v26 = vpop.xlane.xlu0 %1204 }
 0x273   : > { %v1234_v27 = vsub.f32 %v1166_v61, %v1205_v26 }
 0x275   : > { %v2263_v29 = vpop.eup %1865  ;;  %v1252_v30 = vmul.f32 1.442695, %v1234_v27 }
 0x276   : > { %1282 = vadd.xlane.f32.xlu2 %v2263_v29 }
 0x277   : > { %1867 = vpow2.f32 %v1252_v30 }
 0x27a   : > { %v1207_v31 = vpop.xlane.xlu2 %1206 }
 0x27b   : > { %v1235_v33 = vsub.f32 %v1168_v63, %v1207_v31 }
 0x27d   : > { %v2266_v34 = vpop.eup %1867  ;;  %v1254_v36 = vmul.f32 1.442695, %v1235_v33 }
 0x27e   : > { %1284 = vadd.xlane.f32.xlu0 %v2266_v34 }
 0x27f   : > { %1869 = vpow2.f32 %v1254_v36 }
 0x282   : > { %v1209_v38 = vpop.xlane.xlu1 %1208 }
 0x283   : > { %v1236_v39 = vsub.f32 %v1171_v35, %v1209_v38 }
 0x285   : > { %v2269_v40 = vpop.eup %1869  ;;  %v1256_v41 = vmul.f32 1.442695, %v1236_v39 }
 0x286   : > { %1286 = vadd.xlane.f32.xlu1 %v2269_v40 }
 0x287   : > { %1871 = vpow2.f32 %v1256_v41 }
 0x28a   : > { %v1211_v32 = vpop.xlane.xlu2 %1210 }
 0x28b   : > { %v1237_v42 = vsub.f32 %v2227_v0, %v1211_v32 }
 0x28d   : > { %v2273_v37 = vpop.eup %1871  ;;  %v1258_v43 = vmul.f32 1.442695, %v1237_v42 }
 0x28e   : > { %1288 = vadd.xlane.f32.xlu2 %v2273_v37 }
 0x28f   : > { %1873 = vpow2.f32 %v1258_v43 }
 0x292   : > { %v1213_v45 = vpop.xlane.xlu0 %1212 }
 0x293   : > { %v1238_v46 = vsub.f32 %v2230_v51, %v1213_v45 }
 0x295   : > { %v2277_v47 = vpop.eup %1873  ;;  %v1260_v49 = vmul.f32 1.442695, %v1238_v46 }
 0x296   : > { %1290 = vadd.xlane.f32.xlu0 %v2277_v47 }
 0x297   : > { %1875 = vpow2.f32 %v1260_v49 }
 0x29a   : > { %v1215_v50 = vpop.xlane.xlu1 %1214 }
 0x29b   : > { %v1239_v53 = vsub.f32 %v2233_v56, %v1215_v50 }
 0x29d   : > { %v2281_v54 = vpop.eup %1875  ;;  %v1262_v55 = vmul.f32 1.442695, %v1239_v53 }
 0x29e   : > { %1292 = vadd.xlane.f32.xlu1 %v2281_v54 }
 0x29f   : > { %1877 = vpow2.f32 %v1262_v55 }
 0x2a2   : > { %v1217_v48 = vpop.xlane.xlu2 %1216 }
 0x2a3   : > { %v1240_v52 = vsub.f32 %v2236_v4, %v1217_v48 }
 0x2a5   : > { %v2285_v57 = vpop.eup %1877  ;;  %v1264_v58 = vmul.f32 1.442695, %v1240_v52 }
 0x2a6   : > { %1294 = vadd.xlane.f32.xlu2 %v2285_v57 }
 0x2a7   : > { %1879 = vpow2.f32 %v1264_v58 }
 0x2aa   : > { %v1219_v59 = vpop.xlane.xlu0 %1218 }
 0x2ab   : > { %v1241_v60 = vsub.f32 %v2239_v6, %v1219_v59 }
 0x2ad   : > { %v2289_v61 = vpop.eup %1879  ;;  %v1266_v62 = vmul.f32 1.442695, %v1241_v60 }
 0x2ae   : > { %1296 = vadd.xlane.f32.xlu0 %v2289_v61 }
 0x2af   : > { %1881 = vpow2.f32 %v1266_v62 }
 0x2b2   : > { %v1221_v63 = vpop.xlane.xlu1 %1220 }
 0x2b3   : > { %v1242_v28 = vsub.f32 %v2242_v8, %v1221_v63 }
 0x2b5   : > { %v2293_v35 = vpop.eup %1881  ;;  %v1268_v44 = vmul.f32 1.442695, %v1242_v28 }
 0x2b6   : > { %1298 = vadd.xlane.f32.xlu1 %v2293_v35 }
 0x2b7   : > { %1883 = vpow2.f32 %v1268_v44 }
 0x2ba   : > { %v1223_v0 = vpop.xlane.xlu2 %1222 }
 0x2bb   : > { %v1243_v1 = vsub.f32 %v2245_v10, %v1223_v0 }
 0x2bd   : > { %v2297_v51 = vpop.eup %1883  ;;  %v1270_v2 = vmul.f32 1.442695, %v1243_v1 }
 0x2be   : > { %1300 = vadd.xlane.f32.xlu2 %v2297_v51 }
 0x2bf   : > { %1885 = vpow2.f32 %v1270_v2 }
 0x2c2   : > { %v1225_v56 = vpop.xlane.xlu0 %1224 }
 0x2c3   : > { %v1244_v3 = vsub.f32 %v2248_v12, %v1225_v56 }
 0x2c5   : > { %v2301_v4 = vpop.eup %1885  ;;  %v1272_v5 = vmul.f32 1.442695, %v1244_v3 }
 0x2c6   : > { %1302 = vadd.xlane.f32.xlu0 %v2301_v4 }
 0x2c7   : > { %1887 = vpow2.f32 %v1272_v5 }
 0x2ca   : > { %v1227_v6 = vpop.xlane.xlu1 %1226 }
 0x2cb   : > { %v1245_v7 = vsub.f32 %v2251_v14, %v1227_v6 }
 0x2cd   : > { %v2305_v8 = vpop.eup %1887  ;;  %v1274_v9 = vmul.f32 1.442695, %v1245_v7 }
 0x2ce   : > { %1304 = vadd.xlane.f32.xlu1 %v2305_v8 }
 0x2cf   : > { %1889 = vpow2.f32 %v1274_v9 }
 0x2d2   : > { %v1229_v10 = vpop.xlane.xlu2 %1228 }
 0x2d3   : > { %v1246_v11 = vsub.f32 %v2254_v16, %v1229_v10 }
 0x2d5   : > { %v2309_v13 = vpop.eup %1889  ;;  %v1276_v12 = vmul.f32 1.442695, %v1246_v11 }
 0x2d6   : > { %1306 = vadd.xlane.f32.xlu2 %v2309_v13 }
 0x2d7   : > { %1891 = vpow2.f32 %v1276_v12 }
 0x2da   : > { %v1231_v15 = vpop.xlane.xlu0 %1230 }
 0x2db   : > { %v1247_v17 = vsub.f32 %v2257_v21, %v1231_v15 }
 0x2dd   : > { %v2313_v14 = vpop.eup %1891  ;;  %v1278_v18 = vmul.f32 1.442695, %v1247_v17 }
 0x2de   : > { %1308 = vadd.xlane.f32.xlu0 %v2313_v14 }
 0x2df   : > { %1893 = vpow2.f32 %v1278_v18 }
 0x2e1   : > { %v1281_v20 = vpop.xlane.xlu1 %1280 }
 0x2e2   : > { %1895 = vrcp.f32 %v1281_v20 }
 0x2e5   : > { %v2316_v19 = vpop.eup %1893 }
 0x2e6   : > { %1310 = vadd.xlane.f32.xlu1 %v2316_v19 }
 0x2e8   : > { %v1896_v22 = vpop.eup %1895 }
 0x2e9   : > { %v1283_v16 = vpop.xlane.xlu2 %1282  ;;  %v1328_v25 = vmul.f32 %v1896_v22, %v2260_v24 }
 0x2ea   : > { %1897 = vrcp.f32 %v1283_v16 }
 0x2f0   : > { %v1898_v23 = vpop.eup %1897 }
 0x2f1   : > { %v1329_v21 = vmul.f32 %v1898_v23, %v2263_v29  ;;  %v1285_v27 = vpop.xlane.xlu0 %1284 }
 0x2f2   : > { %1899 = vrcp.f32 %v1285_v27 }
 0x2f3   : > { %v1780_v26 = vpack.c.bf16 %v1329_v21, %v1328_v25 }
 0x2f5   : > { %1781 = vst [vmem:[%s2325_s16] sm:$0xff] %v1780_v26  }
 0x2f8   : > { %v1900_v31 = vpop.eup %1899 }
 0x2f9   : > { %v1287_v30 = vpop.xlane.xlu1 %1286  ;;  %v1330_v24 = vmul.f32 %v1900_v31, %v2266_v34 }
 0x2fa   : > { %1901 = vrcp.f32 %v1287_v30 }
 0x300   : > { %v1902_v33 = vpop.eup %1901 }
 0x301   : > { %v1331_v29 = vmul.f32 %v1902_v33, %v2269_v40  ;;  %v1289_v38 = vpop.xlane.xlu2 %1288 }
 0x302   : > { %1903 = vrcp.f32 %v1289_v38 }
 0x303   : > { %v1785_v36 = vpack.c.bf16 %v1331_v29, %v1330_v24 }
 0x305   : > { %1817 = vst [vmem:[%s2325_s16 + $0x8] sm:$0xff] %v1785_v36  }
 0x308   : > { %v1904_v41 = vpop.eup %1903 }
 0x309   : > { %v1291_v39 = vpop.xlane.xlu0 %1290  ;;  %v1332_v42 = vmul.f32 %v1904_v41, %v2273_v37 }
 0x30a   : > { %1905 = vrcp.f32 %v1291_v39 }
 0x310   : > { %v1906_v32 = vpop.eup %1905 }
 0x311   : > { %v1333_v43 = vmul.f32 %v1906_v32, %v2277_v47  ;;  %v1293_v46 = vpop.xlane.xlu1 %1292 }
 0x312   : > { %1907 = vrcp.f32 %v1293_v46 }
 0x313   : > { %v1790_v45 = vpack.c.bf16 %v1333_v43, %v1332_v42 }
 0x315   : > { %1818 = vst [vmem:[%s2325_s16 + $0x10] sm:$0xff] %v1790_v45  }
 0x318   : > { %v1908_v40 = vpop.eup %1907 }
 0x319   : > { %v1295_v34 = vpop.xlane.xlu2 %1294  ;;  %v1334_v50 = vmul.f32 %v1908_v40, %v2281_v54 }
 0x31a   : > { %1909 = vrcp.f32 %v1295_v34 }
 0x320   : > { %v1910_v49 = vpop.eup %1909 }
 0x321   : > { %v1335_v53 = vmul.f32 %v1910_v49, %v2285_v57  ;;  %v1297_v48 = vpop.xlane.xlu0 %1296 }
 0x322   : > { %1911 = vrcp.f32 %v1297_v48 }
 0x323   : > { %v1795_v55 = vpack.c.bf16 %v1335_v53, %v1334_v50 }
 0x325   : > { %1819 = vst [vmem:[%s2325_s16 + $0x18] sm:$0xff] %v1795_v55  }
 0x328   : > { %v1912_v47 = vpop.eup %1911 }
 0x329   : > { %v1299_v37 = vpop.xlane.xlu1 %1298  ;;  %v1336_v58 = vmul.f32 %v1912_v47, %v2289_v61 }
 0x32a   : > { %1913 = vrcp.f32 %v1299_v37 }
 0x330   : > { %v1914_v52 = vpop.eup %1913 }
 0x331   : > { %v1337_v59 = vmul.f32 %v1914_v52, %v2293_v35  ;;  %v1301_v62 = vpop.xlane.xlu2 %1300 }
 0x332   : > { %1915 = vrcp.f32 %v1301_v62 }
 0x333   : > { %v1800_v60 = vpack.c.bf16 %v1337_v59, %v1336_v58 }
 0x335   : > { %1820 = vst [vmem:[%s2325_s16 + $0x20] sm:$0xff] %v1800_v60  }
 0x338   : > { %v1916_v57 = vpop.eup %1915 }
 0x339   : > { %v1303_v54 = vpop.xlane.xlu0 %1302  ;;  %v1338_v28 = vmul.f32 %v1916_v57, %v2297_v51 }
 0x33a   : > { %1917 = vrcp.f32 %v1303_v54 }
 0x340   : > { %v1918_v63 = vpop.eup %1917 }
 0x341   : > { %v1339_v44 = vmul.f32 %v1918_v63, %v2301_v4  ;;  %v1305_v1 = vpop.xlane.xlu1 %1304 }
 0x342   : > { %1919 = vrcp.f32 %v1305_v1 }
 0x343   : > { %v1805_v0 = vpack.c.bf16 %v1339_v44, %v1338_v28 }
 0x345   : > { %1821 = vst [vmem:[%s2325_s16 + $0x28] sm:$0xff] %v1805_v0  }
 0x348   : > { %v1920_v35 = vpop.eup %1919 }
 0x349   : > { %v1307_v61 = vpop.xlane.xlu2 %1306  ;;  %v1340_v56 = vmul.f32 %v1920_v35, %v2305_v8 }
 0x34a   : > { %1921 = vrcp.f32 %v1307_v61 }
 0x350   : > { %v1922_v2 = vpop.eup %1921 }
 0x351   : > { %v1341_v3 = vmul.f32 %v1922_v2, %v2309_v13  ;;  %v1309_v6 = vpop.xlane.xlu0 %1308 }
 0x352   : > { %1923 = vrcp.f32 %v1309_v6 }
 0x353   : > { %v1810_v5 = vpack.c.bf16 %v1341_v3, %v1340_v56 }
 0x355   : > { %1822 = vst [vmem:[%s2325_s16 + $0x30] sm:$0xff] %v1810_v5  }
 0x358   : > { %v1924_v4 = vpop.eup %1923 }
 0x359   : > { %v1311_v51 = vpop.xlane.xlu1 %1310  ;;  %v1342_v9 = vmul.f32 %v1924_v4, %v2313_v14 }
 0x35a   : > { %1925 = vrcp.f32 %v1311_v51 }
 0x360   : > { %v1926_v7 = vpop.eup %1925 }
 0x361   : > { %v1343_v10 = vmul.f32 %v1926_v7, %v2316_v19 }
 0x363   : > { %v1815_v11 = vpack.c.bf16 %v1343_v10, %v1342_v9 }
 0x365   : > { %1823 = vst [vmem:[%s2325_s16 + $0x38] sm:$0xff] %v1815_v11  }
 0x366 PF: > { %s17_s24 = sadd.s32 1, %s1933_s24  }
 0x367   : > { %p14_p4 = scmp.ge.s32.totalorder %s17_s24, 5  }
 0x369   :  { %16 = sbr.rel (!%p14_p4) target bundleno = 1 (0x1), region = 81 }

</bundles_post_ra>
